<compile_context>
chip_gen: v7x
topology: tpu7x:2x2x1
jax: 0.10.0
libtpu: 0.0.40
codegen_flags: <defaults>
</compile_context>

<pallas_src>
import functools

import numpy as np
import jax
import jax.numpy as jnp
from jax.experimental import pallas as pl
from jax.experimental.pallas import tpu as pltpu

LANE = 128


# ----------------------------------------------------------------------------
# Fixed gaussian filter (matches Communication.init_gaussian_filter exactly).
# ----------------------------------------------------------------------------
def gen_gaussian_kernel_2d(k_size=5, sigma=1.0):
    center = k_size // 2
    x, y = np.mgrid[0 - center:k_size - center, 0 - center:k_size - center]
    g = 1 / (2 * np.pi * sigma) * np.exp(
        -(np.square(x) + np.square(y)) / (2 * np.square(sigma)))
    return g.astype(np.float32)


def separable_gaussian_taps(k_size, sigma):
    """The module's 2D gaussian kernel == outer(row_w, col_w) (scale in row_w)."""
    c = k_size // 2
    t = np.arange(k_size) - c
    g = np.exp(-np.square(t) / (2.0 * np.square(sigma)))
    scale = 1.0 / (2.0 * np.pi * sigma)
    return tuple(float(v) for v in scale * g), tuple(float(v) for v in g)


# ----------------------------------------------------------------------------
# Fused kernel: one grid step == T agents' (A, H, W) confidence maps.
# ----------------------------------------------------------------------------
def _comm_kernel(conf_ref, force_ref, mask_ref, map_ref, sum_ref, *scratch,
                 thre, row_w, col_w, w_valid):
    T, A, H, W = conf_ref.shape

    # Anchor-max FIRST, then a single sigmoid (sigmoid is monotone, so this is
    # identical to max-of-sigmoids but does the exp/reciprocal once per pixel).
    m = jnp.max(conf_ref[...], axis=1)                           # (T, H, W)
    ori = pl.reciprocal(1.0 + jnp.exp(-m), approx=True)          # sigmoid on EUP

    if row_w is not None:
        # Separable zero-padded 'same' gaussian conv as two k-tap stencils read
        # from a zero-haloed VMEM scratch.  Pure VPU/load-store work in full
        # f32 (the kernel is HBM-bound, so this costs nothing and avoids the
        # multi-pass HIGHEST matmuls / bf16 threshold flips of the old version).
        pad_ref, = scratch
        c = len(row_w) // 2
        pad_ref[...] = jnp.zeros(pad_ref.shape, pad_ref.dtype)
        pad_ref[:, c:c + H, c:c + W] = ori
        sm = row_w[0] * pad_ref[:, 0:H, c:c + W]
        for d in range(1, len(row_w)):
            sm = sm + row_w[d] * pad_ref[:, d:d + H, c:c + W]
        pad_ref[:, c:c + H, c:c + W] = sm
        sm = col_w[0] * pad_ref[:, c:c + H, 0:W]
        for d in range(1, len(col_w)):
            sm = sm + col_w[d] * pad_ref[:, c:c + H, d:d + W]
    else:
        sm = ori

    mask = (sm > thre).astype(jnp.float32)           # pre-override {0,1} mask

    # per-agent pixel count of the PRE-override mask -> ego communication rate
    if w_valid != W:                                 # lane-padded width: ignore pad lanes
        lane = jax.lax.broadcasted_iota(jnp.int32, (T, H, W), 2)
        cnt = jnp.where(lane < w_valid, mask, 0.0)
    else:
        cnt = mask
    s = jnp.sum(cnt, axis=2, keepdims=True)          # (T, H, 1)
    s = jnp.sum(s, axis=1, keepdims=True)            # (T, 1, 1)
    sum_ref[...] = jnp.broadcast_to(s[None], sum_ref.shape)      # lane-dense slab

    # even-indexed agents (within their batch) are forced to an all-ones mask
    mask_nd = jnp.maximum(mask, force_ref[...])      # force_ref: (T,1,1) broadcast
    mask_ref[...] = mask_nd[:, None]                 # (T, 1, H, W)
    map_ref[...] = (ori * mask_nd)[:, None]


def _communication_pallas(conf_all, force, *, thre, taps, w_valid, block_agents):
    Npad, A, H, W = conf_all.shape
    T = block_agents
    nblk = Npad // T
    row_w, col_w = taps if taps is not None else (None, None)

    kernel = functools.partial(_comm_kernel, thre=float(thre),
                               row_w=row_w, col_w=col_w, w_valid=int(w_valid))

    scratch_shapes = []
    if taps is not None:
        c = len(row_w) // 2
        scratch_shapes = [pltpu.VMEM((T, H + 2 * c, W + 2 * c), jnp.float32)]

    return pl.pallas_call(
        kernel,
        out_shape=(
            jax.ShapeDtypeStruct((Npad, 1, H, W), jnp.float32),    # mask_nodiag
            jax.ShapeDtypeStruct((Npad, 1, H, W), jnp.float32),    # ori * mask_nodiag
            jax.ShapeDtypeStruct((nblk, T, 1, LANE), jnp.float32),  # per-agent sums
        ),
        grid=(nblk,),
        in_specs=[
            pl.BlockSpec((T, A, H, W), lambda n: (n, 0, 0, 0)),
            pl.BlockSpec((T, 1, 1), lambda n: (n, 0, 0)),
        ],
        out_specs=(
            pl.BlockSpec((T, 1, H, W), lambda n: (n, 0, 0, 0)),
            pl.BlockSpec((T, 1, H, W), lambda n: (n, 0, 0, 0)),
            pl.BlockSpec((1, T, 1, LANE), lambda n: (n, 0, 0, 0)),
        ),
        scratch_shapes=scratch_shapes,
        compiler_params=pltpu.CompilerParams(
            dimension_semantics=("parallel",)),
    )(conf_all, force)


# ----------------------------------------------------------------------------
# Forward wrapper (matches Communication.forward).
# ----------------------------------------------------------------------------
def communication_forward(batch_confidence_maps, record_len, pairwise_t_matrix,
                          *, thre, gaussian_smooth=None, max_block_agents=8):
    """batch_confidence_maps: preferably a pre-stacked (sum(N_b), A, H, W) array
                              (no extra HBM pass), or the per-batch list the torch
                              module takes.
       record_len           : B static ints (N_b)
       pairwise_t_matrix    : (B, L, L, 4, 4) -- only its batch size is consumed
       gaussian_smooth      : None or (k_size, c_sigma)"""
    # TODO(synk): record_len must be static python ints (the reference produces a
    #             ragged per-batch list); traced/dynamic lengths are not supported.
    B = int(pairwise_t_matrix.shape[0])
    Ns = [int(record_len[b]) for b in range(B)]

    if isinstance(batch_confidence_maps, (list, tuple)):
        conf_all = jnp.concatenate(
            [jnp.asarray(x, jnp.float32) for x in batch_confidence_maps], axis=0)
    else:
        conf_all = jnp.asarray(batch_confidence_maps, jnp.float32)
    Ntot, A, H, W = conf_all.shape
    assert Ntot == sum(Ns)

    # lane-pad W to a multiple of 128 (lane-dense stores); pad with a large
    # negative logit so sigmoid(pad) ~ 0, matching the conv's zero padding.
    Wp = -(-W // LANE) * LANE
    if Wp != W:
        conf_all = jnp.pad(conf_all, ((0, 0), (0, 0), (0, 0), (0, Wp - W)),
                           constant_values=-30.0)

    # agents per grid step: as large as possible to amortise per-step overhead,
    # but keep >= 2 grid steps so both v7x TensorCores get work.
    nblk = max(-(-Ntot // max_block_agents), min(2, Ntot))
    T = -(-Ntot // nblk)
    Npad = nblk * T
    if Npad != Ntot:
        conf_all = jnp.pad(conf_all, ((0, Npad - Ntot), (0, 0), (0, 0), (0, 0)))

    # per-agent "force all-ones" flags: even index within each batch
    force = np.zeros((Npad, 1, 1), np.float32)
    off = 0
    for N in Ns:
        force[off:off + N:2] = 1.0
        off += N
    force = jnp.asarray(force)

    taps = None
    if gaussian_smooth is not None:
        k_size, c_sigma = gaussian_smooth
        taps = separable_gaussian_taps(k_size, c_sigma)

    masks, maps, sums = _communication_pallas(
        conf_all, force, thre=thre, taps=taps, w_valid=W, block_agents=T)

    if Wp != W:
        masks = masks[..., :W]
        maps = maps[..., :W]
    sums_flat = sums[:, :, 0, 0].reshape(-1)             # (Npad,)

    offs = np.concatenate([[0], np.cumsum(Ns)]).astype(int)
    batch_communication_maps = [maps[offs[b]:offs[b + 1]] for b in range(B)]
    communication_masks = masks[:Ntot]                    # == torch.concat(..., dim=0)
    rates = jnp.stack([sums_flat[offs[b]] for b in range(B)]) / float(H * W)
    communication_rates = jnp.mean(rates)
    return batch_communication_maps, communication_masks, communication_rates


# ----------------------------------------------------------------------------
# Pure-numpy reference for verification.
# ----------------------------------------------------------------------------
def _reference_numpy(batch_confidence_maps, thre, gaussian_smooth):
    _, _, H, W = batch_confidence_maps[0].shape
    gauss = None
    if gaussian_smooth is not None:
        gauss = gen_gaussian_kernel_2d(*gaussian_smooth)
    all_masks, all_maps, rates = [], [], []
    for conf in batch_confidence_maps:
        conf = np.asarray(conf, np.float32)
        ori = (1.0 / (1.0 + np.exp(-conf))).max(axis=1, keepdims=True)
        if gauss is not None:
            k = gauss.shape[0]
            p = k // 2
            padded = np.pad(ori, ((0, 0), (0, 0), (p, p), (p, p)))
            sm = np.zeros_like(ori)
            for di in range(k):
                for dj in range(k):
                    sm = sm + gauss[di, dj] * padded[:, :, di:di + H, dj:dj + W]
        else:
            sm = ori
        mask = (sm > thre).astype(np.float32)
        rates.append(float(mask[0].sum()) / (H * W))
        mask_nd = mask.copy()
        mask_nd[::2] = 1.0
        all_masks.append(mask_nd)
        all_maps.append(ori * mask_nd)
    return all_maps, np.concatenate(all_masks, axis=0), float(np.mean(rates))


if __name__ == "__main__":
    B, L = 2, 5
    A, H, W = 2, 32, 128
    record_len = [3, 2]
    thre = 0.5
    gaussian_smooth = (5, 1.0)     # (k_size, c_sigma), as in the module's args

    key = jax.random.PRNGKey(0)
    Ntot = sum(record_len)
    # producer hands the kernel one already-stacked (Ntot, A, H, W) tensor
    conf_all = 2.0 * jax.random.normal(key, (Ntot, A, H, W), jnp.float32)
    pairwise_t_matrix = jnp.broadcast_to(
        jnp.eye(4, dtype=jnp.float32), (B, L, L, 4, 4))

    conf_np = np.asarray(conf_all)
    offs = np.concatenate([[0], np.cumsum(record_len)]).astype(int)
    conf_list_np = [conf_np[offs[b]:offs[b + 1]] for b in range(B)]

    for gs in (gaussian_smooth, None):     # smoothed + unsmoothed code paths
        batch_maps, comm_masks, comm_rate = communication_forward(
            conf_all, record_len, pairwise_t_matrix,
            thre=thre, gaussian_smooth=gs)
        comm_masks = jax.block_until_ready(comm_masks)
        comm_rate = jax.block_until_ready(comm_rate)
        batch_maps = [jax.block_until_ready(m) for m in batch_maps]

        assert comm_masks.shape == (Ntot, 1, H, W), comm_masks.shape
        assert all(batch_maps[b].shape == (record_len[b], 1, H, W)
                   for b in range(B))
        assert bool(jnp.all(jnp.isfinite(comm_masks)))
        assert bool(jnp.all((comm_masks == 0.0) | (comm_masks == 1.0)))
        assert 0.0 <= float(comm_rate) <= 1.0

        # tolerant check vs a float32 numpy reference (approx EUP sigmoid +
        # different f32 summation order -> allow a handful of near-threshold flips)
        ref_maps, ref_masks, ref_rate = _reference_numpy(conf_list_np, thre, gs)
        got_maps = np.concatenate([np.asarray(m) for m in batch_maps], axis=0)
        mask_mismatch = float(np.mean(np.asarray(comm_masks) != ref_masks))
        maps_err = float(np.mean(np.abs(got_maps - np.concatenate(ref_maps, 0))))
        assert mask_mismatch < 1e-2, mask_mismatch
        assert maps_err < 5e-3, maps_err
        assert abs(float(comm_rate) - ref_rate) < 2e-2, (float(comm_rate), ref_rate)

    print("KERNEL_OK")
</pallas_src>

<mosaic_0001>
module attributes {stable_mosaic.version = 11 : i64} {
  func.func @_comm_kernel(%arg0: i32, %arg1: memref<3x2x32x128xf32, #tpu.memory_space<vmem>>, %arg2: memref<3x1x1xf32, #tpu.memory_space<vmem>>, %arg3: memref<3x1x32x128xf32, #tpu.memory_space<vmem>>, %arg4: memref<3x1x32x128xf32, #tpu.memory_space<vmem>>, %arg5: memref<1x3x1x128xf32, #tpu.memory_space<vmem>>, %arg6: memref<3x36x132xf32, #tpu.memory_space<vmem>>) attributes {dimension_semantics = [#tpu.dimension_semantics<parallel>], iteration_bounds = array<i64: 2>, scalar_prefetch = 0 : i64, scratch_operands = 1 : i64, tpu.core_type = #tpu.core_type<tc>, window_params = [{transform_indices = @transform_0, window_bounds = array<i64: 3, 2, 32, 128>}, {transform_indices = @transform_1, window_bounds = array<i64: 3, 1, 1>}, {transform_indices = @transform_2, window_bounds = array<i64: 3, 1, 32, 128>}, {transform_indices = @transform_3, window_bounds = array<i64: 3, 1, 32, 128>}, {transform_indices = @transform_4, window_bounds = array<i64: 1, 3, 1, 128>}]} {
    %c0 = arith.constant 0 : index
    %c0_0 = arith.constant 0 : index
    %c0_1 = arith.constant 0 : index
    %c0_2 = arith.constant 0 : index
    %0 = vector.load %arg1[%c0, %c0_0, %c0_1, %c0_2] : memref<3x2x32x128xf32, #tpu.memory_space<vmem>>, vector<3x2x32x128xf32>
    %cst = arith.constant dense<0xFF800000> : vector<3x32x128xf32>
    %1 = vector.multi_reduction <maximumf>, %0, %cst [1] : vector<3x2x32x128xf32> to vector<3x32x128xf32>
    %cst_3 = arith.constant 0.000000e+00 : f32
    %2 = vector.broadcast %cst_3 : f32 to vector<3x32x128xf32>
    %3 = arith.subf %2, %1 : vector<3x32x128xf32>
    %4 = math.exp %3 : vector<3x32x128xf32>
    %cst_4 = arith.constant 1.000000e+00 : f32
    %5 = vector.broadcast %cst_4 : f32 to vector<3x32x128xf32>
    %6 = arith.addf %5, %4 : vector<3x32x128xf32>
    %7 = tpu.reciprocal %6 {approx = true} : vector<3x32x128xf32> -> vector<3x32x128xf32>
    %cst_5 = arith.constant 0.000000e+00 : f32
    %8 = vector.broadcast %cst_5 : f32 to vector<3x36x132xf32>
    %c0_6 = arith.constant 0 : index
    %c0_7 = arith.constant 0 : index
    %c0_8 = arith.constant 0 : index
    %9 = vector.load %arg6[%c0_6, %c0_7, %c0_8] : memref<3x36x132xf32, #tpu.memory_space<vmem>>, vector<3x36x132xf32>
    tpu.vector_store %arg6[%c0_6, %c0_7, %c0_8], %8 {strides = array<i32>} : memref<3x36x132xf32, #tpu.memory_space<vmem>>, vector<3x36x132xf32>,
    %c0_9 = arith.constant 0 : index
    %c2 = arith.constant 2 : index
    %c2_10 = arith.constant 2 : index
    %10 = vector.load %arg6[%c0_9, %c2, %c2_10] : memref<3x36x132xf32, #tpu.memory_space<vmem>>, vector<3x32x128xf32>
    tpu.vector_store %arg6[%c0_9, %c2, %c2_10], %7 {strides = array<i32>} : memref<3x36x132xf32, #tpu.memory_space<vmem>>, vector<3x32x128xf32>,
    %c0_11 = arith.constant 0 : index
    %c0_12 = arith.constant 0 : index
    %c2_13 = arith.constant 2 : index
    %11 = vector.load %arg6[%c0_11, %c0_12, %c2_13] : memref<3x36x132xf32, #tpu.memory_space<vmem>>, vector<3x32x128xf32>
    %cst_14 = arith.constant 0.0215392802 : f32
    %12 = vector.broadcast %cst_14 : f32 to vector<3x32x128xf32>
    %13 = arith.mulf %12, %11 : vector<3x32x128xf32>
    %c0_15 = arith.constant 0 : index
    %c1 = arith.constant 1 : index
    %c2_16 = arith.constant 2 : index
    %14 = vector.load %arg6[%c0_15, %c1, %c2_16] : memref<3x36x132xf32, #tpu.memory_space<vmem>>, vector<3x32x128xf32>
    %cst_17 = arith.constant 0.0965323522 : f32
    %15 = vector.broadcast %cst_17 : f32 to vector<3x32x128xf32>
    %16 = arith.mulf %15, %14 : vector<3x32x128xf32>
    %17 = arith.addf %13, %16 : vector<3x32x128xf32>
    %c0_18 = arith.constant 0 : index
    %c2_19 = arith.constant 2 : index
    %c2_20 = arith.constant 2 : index
    %18 = vector.load %arg6[%c0_18, %c2_19, %c2_20] : memref<3x36x132xf32, #tpu.memory_space<vmem>>, vector<3x32x128xf32>
    %cst_21 = arith.constant 0.159154937 : f32
    %19 = vector.broadcast %cst_21 : f32 to vector<3x32x128xf32>
    %20 = arith.mulf %19, %18 : vector<3x32x128xf32>
    %21 = arith.addf %17, %20 : vector<3x32x128xf32>
    %c0_22 = arith.constant 0 : index
    %c3 = arith.constant 3 : index
    %c2_23 = arith.constant 2 : index
    %22 = vector.load %arg6[%c0_22, %c3, %c2_23] : memref<3x36x132xf32, #tpu.memory_space<vmem>>, vector<3x32x128xf32>
    %cst_24 = arith.constant 0.0965323522 : f32
    %23 = vector.broadcast %cst_24 : f32 to vector<3x32x128xf32>
    %24 = arith.mulf %23, %22 : vector<3x32x128xf32>
    %25 = arith.addf %21, %24 : vector<3x32x128xf32>
    %c0_25 = arith.constant 0 : index
    %c4 = arith.constant 4 : index
    %c2_26 = arith.constant 2 : index
    %26 = vector.load %arg6[%c0_25, %c4, %c2_26] : memref<3x36x132xf32, #tpu.memory_space<vmem>>, vector<3x32x128xf32>
    %cst_27 = arith.constant 0.0215392802 : f32
    %27 = vector.broadcast %cst_27 : f32 to vector<3x32x128xf32>
    %28 = arith.mulf %27, %26 : vector<3x32x128xf32>
    %29 = arith.addf %25, %28 : vector<3x32x128xf32>
    %c0_28 = arith.constant 0 : index
    %c2_29 = arith.constant 2 : index
    %c2_30 = arith.constant 2 : index
    %30 = vector.load %arg6[%c0_28, %c2_29, %c2_30] : memref<3x36x132xf32, #tpu.memory_space<vmem>>, vector<3x32x128xf32>
    tpu.vector_store %arg6[%c0_28, %c2_29, %c2_30], %29 {strides = array<i32>} : memref<3x36x132xf32, #tpu.memory_space<vmem>>, vector<3x32x128xf32>,
    %c0_31 = arith.constant 0 : index
    %c2_32 = arith.constant 2 : index
    %c0_33 = arith.constant 0 : index
    %31 = vector.load %arg6[%c0_31, %c2_32, %c0_33] : memref<3x36x132xf32, #tpu.memory_space<vmem>>, vector<3x32x128xf32>
    %cst_34 = arith.constant 0.135335281 : f32
    %32 = vector.broadcast %cst_34 : f32 to vector<3x32x128xf32>
    %33 = arith.mulf %32, %31 : vector<3x32x128xf32>
    %c0_35 = arith.constant 0 : index
    %c2_36 = arith.constant 2 : index
    %c1_37 = arith.constant 1 : index
    %34 = vector.load %arg6[%c0_35, %c2_36, %c1_37] : memref<3x36x132xf32, #tpu.memory_space<vmem>>, vector<3x32x128xf32>
    %cst_38 = arith.constant 0.606530666 : f32
    %35 = vector.broadcast %cst_38 : f32 to vector<3x32x128xf32>
    %36 = arith.mulf %35, %34 : vector<3x32x128xf32>
    %37 = arith.addf %33, %36 : vector<3x32x128xf32>
    %c0_39 = arith.constant 0 : index
    %c2_40 = arith.constant 2 : index
    %c2_41 = arith.constant 2 : index
    %38 = vector.load %arg6[%c0_39, %c2_40, %c2_41] : memref<3x36x132xf32, #tpu.memory_space<vmem>>, vector<3x32x128xf32>
    %cst_42 = arith.constant 1.000000e+00 : f32
    %39 = vector.broadcast %cst_42 : f32 to vector<3x32x128xf32>
    %40 = arith.mulf %39, %38 : vector<3x32x128xf32>
    %41 = arith.addf %37, %40 : vector<3x32x128xf32>
    %c0_43 = arith.constant 0 : index
    %c2_44 = arith.constant 2 : index
    %c3_45 = arith.constant 3 : index
    %42 = vector.load %arg6[%c0_43, %c2_44, %c3_45] : memref<3x36x132xf32, #tpu.memory_space<vmem>>, vector<3x32x128xf32>
    %cst_46 = arith.constant 0.606530666 : f32
    %43 = vector.broadcast %cst_46 : f32 to vector<3x32x128xf32>
    %44 = arith.mulf %43, %42 : vector<3x32x128xf32>
    %45 = arith.addf %41, %44 : vector<3x32x128xf32>
    %c0_47 = arith.constant 0 : index
    %c2_48 = arith.constant 2 : index
    %c4_49 = arith.constant 4 : index
    %46 = vector.load %arg6[%c0_47, %c2_48, %c4_49] : memref<3x36x132xf32, #tpu.memory_space<vmem>>, vector<3x32x128xf32>
    %cst_50 = arith.constant 0.135335281 : f32
    %47 = vector.broadcast %cst_50 : f32 to vector<3x32x128xf32>
    %48 = arith.mulf %47, %46 : vector<3x32x128xf32>
    %49 = arith.addf %45, %48 : vector<3x32x128xf32>
    %cst_51 = arith.constant 5.000000e-01 : f32
    %50 = vector.broadcast %cst_51 : f32 to vector<3x32x128xf32>
    %51 = arith.cmpf ogt, %49, %50 : vector<3x32x128xf32>
    %52 = arith.extui %51 : vector<3x32x128xi1> to vector<3x32x128xi32>
    %53 = arith.sitofp %52 : vector<3x32x128xi32> to vector<3x32x128xf32>
    %cst_52 = arith.constant dense<0.000000e+00> : vector<3x32xf32>
    %54 = vector.multi_reduction <add>, %53, %cst_52 [2] : vector<3x32x128xf32> to vector<3x32xf32>
    %55 = vector.shape_cast %54 : vector<3x32xf32> to vector<3x32x1xf32>
    %cst_53 = arith.constant dense<0.000000e+00> : vector<3x1xf32>
    %56 = vector.multi_reduction <add>, %55, %cst_53 [1] : vector<3x32x1xf32> to vector<3x1xf32>
    %57 = vector.shape_cast %56 : vector<3x1xf32> to vector<3x1x1xf32>
    %58 = vector.shape_cast %57 : vector<3x1x1xf32> to vector<1x3x1x1xf32>
    %59 = vector.shape_cast %58 : vector<1x3x1x1xf32> to vector<1x3x1x1xf32>
    %60 = vector.broadcast %59 : vector<1x3x1x1xf32> to vector<1x3x1x128xf32>
    %c0_54 = arith.constant 0 : index
    %c0_55 = arith.constant 0 : index
    %c0_56 = arith.constant 0 : index
    %c0_57 = arith.constant 0 : index
    %61 = vector.load %arg5[%c0_54, %c0_55, %c0_56, %c0_57] : memref<1x3x1x128xf32, #tpu.memory_space<vmem>>, vector<1x3x1x128xf32>
    tpu.vector_store %arg5[%c0_54, %c0_55, %c0_56, %c0_57], %60 {strides = array<i32>} : memref<1x3x1x128xf32, #tpu.memory_space<vmem>>, vector<1x3x1x128xf32>,
    %c0_58 = arith.constant 0 : index
    %c0_59 = arith.constant 0 : index
    %c0_60 = arith.constant 0 : index
    %62 = vector.load %arg2[%c0_58, %c0_59, %c0_60] : memref<3x1x1xf32, #tpu.memory_space<vmem>>, vector<3x1x1xf32>
    %63 = vector.broadcast %62 : vector<3x1x1xf32> to vector<3x32x128xf32>
    %64 = arith.maximumf %53, %63 : vector<3x32x128xf32>
    %65 = vector.shape_cast %64 : vector<3x32x128xf32> to vector<3x1x32x128xf32>
    %c0_61 = arith.constant 0 : index
    %c0_62 = arith.constant 0 : index
    %c0_63 = arith.constant 0 : index
    %c0_64 = arith.constant 0 : index
    %66 = vector.load %arg3[%c0_61, %c0_62, %c0_63, %c0_64] : memref<3x1x32x128xf32, #tpu.memory_space<vmem>>, vector<3x1x32x128xf32>
    tpu.vector_store %arg3[%c0_61, %c0_62, %c0_63, %c0_64], %65 {strides = array<i32>} : memref<3x1x32x128xf32, #tpu.memory_space<vmem>>, vector<3x1x32x128xf32>,
    %67 = arith.mulf %7, %64 : vector<3x32x128xf32>
    %68 = vector.shape_cast %67 : vector<3x32x128xf32> to vector<3x1x32x128xf32>
    %c0_65 = arith.constant 0 : index
    %c0_66 = arith.constant 0 : index
    %c0_67 = arith.constant 0 : index
    %c0_68 = arith.constant 0 : index
    %69 = vector.load %arg4[%c0_65, %c0_66, %c0_67, %c0_68] : memref<3x1x32x128xf32, #tpu.memory_space<vmem>>, vector<3x1x32x128xf32>
    tpu.vector_store %arg4[%c0_65, %c0_66, %c0_67, %c0_68], %68 {strides = array<i32>} : memref<3x1x32x128xf32, #tpu.memory_space<vmem>>, vector<3x1x32x128xf32>,
    return
  }
  func.func @transform_0(%arg0: i32) -> (i32, i32, i32, i32) {
    %c0_i32 = arith.constant 0 : i32
    %c0_i32_0 = arith.constant 0 : i32
    %c0_i32_1 = arith.constant 0 : i32
    %c0_i32_2 = arith.constant 0 : i32
    return %arg0, %c0_i32, %c0_i32_0, %c0_i32_1 : i32, i32, i32, i32
  }
  func.func @transform_1(%arg0: i32) -> (i32, i32, i32) {
    %c0_i32 = arith.constant 0 : i32
    %c0_i32_0 = arith.constant 0 : i32
    %c0_i32_1 = arith.constant 0 : i32
    return %arg0, %c0_i32, %c0_i32_0 : i32, i32, i32
  }
  func.func @transform_2(%arg0: i32) -> (i32, i32, i32, i32) {
    %c0_i32 = arith.constant 0 : i32
    %c0_i32_0 = arith.constant 0 : i32
    %c0_i32_1 = arith.constant 0 : i32
    %c0_i32_2 = arith.constant 0 : i32
    return %arg0, %c0_i32, %c0_i32_0, %c0_i32_1 : i32, i32, i32, i32
  }
  func.func @transform_3(%arg0: i32) -> (i32, i32, i32, i32) {
    %c0_i32 = arith.constant 0 : i32
    %c0_i32_0 = arith.constant 0 : i32
    %c0_i32_1 = arith.constant 0 : i32
    %c0_i32_2 = arith.constant 0 : i32
    return %arg0, %c0_i32, %c0_i32_0, %c0_i32_1 : i32, i32, i32, i32
  }
  func.func @transform_4(%arg0: i32) -> (i32, i32, i32, i32) {
    %c0_i32 = arith.constant 0 : i32
    %c0_i32_0 = arith.constant 0 : i32
    %c0_i32_1 = arith.constant 0 : i32
    %c0_i32_2 = arith.constant 0 : i32
    return %arg0, %c0_i32, %c0_i32_0, %c0_i32_1 : i32, i32, i32, i32
  }
}

</mosaic_0001>

<bundles_post_ra>
// kernel: tpu_custom_call.1
= control target key start
LH: loop header
LB: loop body
LE: loop exit
PB: predicated region body
PF: predicated region fallthrough
CT: control target
= control target key end

     0   :  { %10 = vsyncpa [#allocation4], 0  ;;  %s4420_s0 = inlined_call_operand.hbm [shape: f32[6,2,32,128], index: 0, kind: input, shape index: {}]   ;;  %s4421_s1 = inlined_call_operand.vmem [shape: f32[6,1,1], index: 1, kind: input, shape index: {}]   ;;  %s4422_s2 = inlined_call_operand.hbm [shape: f32[6,1,32,128], index: 2, kind: output, shape index: {0}]   ;;  %s4423_s3 = inlined_call_operand.hbm [shape: f32[6,1,32,128], index: 3, kind: output, shape index: {1}]   ;;  %s4424_s4 = inlined_call_operand.hbm [shape: f32[2,3,1,128], index: 4, kind: output, shape index: {2}]  }
   0x1   :  { %12 = vsyncpa [#allocation4 + $0x1], 0 }
   0x2   :  { %13 = vsyncpa [#allocation5], 0 }
   0x3   :  { %15 = vsyncpa [#allocation5 + $0x1], 0 }
   0x4   :  { %16 = vsyncpa [#allocation8], 0 }
   0x5   :  { %18 = vsyncpa [#allocation8 + $0x1], 0  ;;  %s2794_s15 = smov 0   ;;  %s2796_s16 = smov 0  }
   0x6   :  { %s2798_s17 = smov 0   ;;  %s2800_s18 = smov 0  }
   0x7 LB: > { %s2815_s19 = sadd.s32 4294967295, %s2750_s18   ;;  %s4460_s20 = sadd.s32 4294967294, %s2750_s18   ;;  %s2750_s18 = sphi %s2800_s18, %s4562_s18   ;;  %s2746_s17 = sphi %s2798_s17, %s4561_s17   ;;  %s2742_s16 = sphi %s2796_s16, %s4560_s16   ;;  %s2738_s15 = sphi %s2794_s15, %s4559_s15  }
   0x8   : > { %s2819_s21 = sadd.s32 1, %s2750_s18   ;;  %s31_s22 = sadd.s32 1, %s2746_s17 }
   0x9   : > { %s28_s23 = ssub.s32 %s2750_s18, %s2819_s21  ;;  %p38_p0 = scmp.ne.s32.totalorder %s2746_s17, %s2742_s16 }
   0xa   : > { %p29_p1 = scmp.eq.s32.totalorder %s28_s23, 0  ;;  %p39_p2 = scmp.eq.s32.totalorder %s2750_s18, 0 }
   0xb   : > { %p44_p3 = scmp.ne.s32.totalorder %s2742_s16, %s2738_s15  ;;  %p45_p4 = scmp.eq.s32.totalorder %s2815_s19, 0 }
   0xc   : > { %s2831_s24 = scalar_select %p29_p1, %s2746_s17, %s31_s22  }
   0xd   : > { %p40_p5 = por %p39_p2, %p38_p0  ;;  %p2833_p6 = por %p45_p4, %p44_p3 }
   0xe   : > { %p94_p7 = scmp.eq.s32.totalorder %s2815_s19, 1  ;;  %p100_p8 = scmp.eq.s32.totalorder %s4460_s20, 1 }
   0xf   : > { %p2496_p10 = scmp.lt.s32.totalorder %s2750_s18, 2  ;;  %s172_s28 = sand.u32 1, %s2746_s17  }
  0x10   : > { %p2842_p11 = por %p94_p7, %p38_p0  ;;  %p2846_p12 = por %p100_p8, %p44_p3 }
  0x11   : > { %s2466_s29 = smul.u32 3072, %s2750_s18  ;;  %p2857_p13 = pnand %p2496_p10, %p40_p5 }
  0x12   : > { %s4462_s26 = scalar_select %p2842_p11, 1, 0 }
  0x13   : > { %s4463_s27 = scalar_select %p2846_p12, 1, 0 }
  0x14   : > { %s2469_s30 = smul.u32 192, %s172_s28  ;;  %s2855_s7 = scalar_lea.hbm %s4420_s0, %s2466_s29 }
  0x15   : > { %s2863_s11 = scalar_lea.sflag [#allocation4], %s172_s28  ;;  %s2594_s12 = scalar_lea.hbm %s2855_s7, 3072 }
  0x16   : > { %s176_s9 = scalar_lea.vmem [#allocation3], %s2469_s30  ;;  %p2595_p0 = scmp.ne.s32.totalorder %s2855_s7, %s2594_s12 }
  0x17   : > { %s184_s10 = sshll.u32 %s176_s9, 4  ;;  %p2596_p1 = pneg %p2857_p13  ;;  %s2861_s10 = int_to_ptr.vmem [resolvable:$true] %s184_s10 }
  0x18   : > { %s2599_s22 = scalar_lea.hbm %s4420_s0, 6144  ;;  %p2600_p4 = scmp.lt.u32.totalorder %s2855_s7, %s4420_s0 }
  0x19   : > { %p2597_p2 = pnand %p2596_p1, %p2595_p0  ;;  %p2601_p5 = scmp.lt.u32.totalorder %s2599_s22, %s2594_s12 }
  0x1a   : > { %p2603_p8 = scmp.lt.u32.totalorder %s2594_s12, %s2855_s7 }
  0x1b   : > { %p2598_p3 = pneg %p2597_p2  ;;  %p2602_p7 = por %p2601_p5, %p2600_p4 }
  0x1d   : > { %p2604_p10 = por %p2603_p8, %p2602_p7 }
  0x1f   : > { %p2605_p9 = pnand %p2604_p10, %p2598_p3 }
  0x21   : > { %2608 = shalt.err (!%p2605_p9)
}
  0x22   : > { %s2609_s28 = scalar_lea.vmem %s2861_s10, 3072  ;;  %s2752_s30 = smov [#allocation3]  }
  0x23   : > { %p2610_p0 = scmp.ne.s32.totalorder %s2861_s10, %s2609_s28  ;;  %s2614_s5 = sshll.u32 %s2752_s30, 4  ;;  %s2615_s5 = int_to_ptr.vmem [resolvable:$false] %s2614_s5 }
  0x24   : > { %s2616_s6 = scalar_lea.vmem %s2615_s5, 6144  ;;  %p2617_p11 = scmp.lt.s32.totalorder %s2861_s10, %s2615_s5 }
  0x25   : > { %p2612_p2 = pnand %p2610_p0, %p2596_p1  ;;  %p2618_p4 = scmp.lt.s32.totalorder %s2616_s6, %s2609_s28 }
  0x27   : > { %p2613_p12 = pneg %p2612_p2  ;;  %p2619_p5 = por %p2618_p4, %p2617_p11 }
  0x29   : > { %p2620_p7 = pnand %p2619_p5, %p2613_p12 }
  0x2b   : > { %2623 = shalt.err (!%p2620_p7)
}
  0x2c   : > { %s2753_s9 = smov 128   ;;  %s2754_s12 = smov 8  }
  0x2d   : > { %2485 = dma.hbm_to_vmem [thread:$0]  (!%p2857_p13), %s2855_s7, 3072, %s2861_s10, %s2863_s11, %s2753_s9, %s2753_s9, %s2754_s12  }
  0x2e   : > { %p2434_p9 = scmp.ge.s32.totalorder %s2750_s18, 1  ;;  %p200_p1 = scmp.lt.s32.totalorder %s2750_s18, 3 }
  0x30   : > { %p201_p3 = pnand %p2434_p9, %p200_p1 }
  0x32   : > { %204 = sbr.rel (%p201_p3) target bundleno = 917 (0x395), region = 28 }
  0x39   : > { %s2894_s13 = sand.u32 1, %s2742_s16  }
  0x3a   : > { %s2470_s14 = smul.u32 192, %s2894_s13  ;;  %s207_s22 = scalar_lea.sflag [#allocation4], %s2894_s13 }
  0x3c   : > { %s2898_s23 = scalar_lea.vmem [#allocation3], %s2470_s14 }
  0x3d   : > { %2725 = dma.done.wait (%p2833_p6), %s207_s22, 3072  }
  0x3e   : > { %2727 = vsyncadd (%p2833_p6), %s207_s22, 4294964224  ;;  %vm354_vm0 = vcmask 31744   ;;  %v4426_v0 = vmov 0.0   ;;  %v265_v1 = vld [vmem:[%s2898_s23 + $0x40] sm:$0xff]  ;;  %v268_v6 = vld [vmem:[%s2898_s23 + $0x58] sm:$0xff]  ;;  %vm363_vm1 = vcmask 27648  }
  0x3f   : > { %365 = vst [vmem:[#allocation2 + $0x50] sm:$0xff] %v4426_v0  ;;  %366 = vst.msk [vmem:[#allocation2 + $0x58] sm:$0xff] %vm354_vm0, %v4426_v0  ;;  %v269_v2 = vld [vmem:[%s2898_s23 + $0x60] sm:$0xff]  ;;  %v272_v7 = vld [vmem:[%s2898_s23 + $0x78] sm:$0xff]  ;;  %s2756_s25 = smov 2   ;;  %vm397_vm2 = vcmask 1041408  }
  0x40   : > { %353 = vst [vmem:[#allocation2] sm:$0xff] %v4426_v0  ;;  %355 = vst.msk [vmem:[#allocation2 + $0x8] sm:$0xff] %vm354_vm0, %v4426_v0  ;;  %v257_v3 = vld [vmem:[%s2898_s23] sm:$0xff]  ;;  %v285_v4 = vmax.f32 %v265_v1, %v269_v2  ;;  %v288_v9 = vmax.f32 %v268_v6, %v272_v7  ;;  %v260_v10 = vld [vmem:[%s2898_s23 + $0x18] sm:$0xff]  ;;  %vm464_vm3 = vcmask 1047570   ;;  %vm466_vm4 = vcmask 15362  }
  0x41   : > { %356 = vst [vmem:[#allocation2 + $0x10] sm:$0xff] %v4426_v0  ;;  %357 = vst.msk [vmem:[#allocation2 + $0x18] sm:$0xff] %vm354_vm0, %v4426_v0  ;;  %v261_v5 = vld [vmem:[%s2898_s23 + $0x20] sm:$0xff]  ;;  %v264_v11 = vld [vmem:[%s2898_s23 + $0x38] sm:$0xff]  ;;  %vm476_vm5 = vcmask 1041424   ;;  %vm478_vm6 = vcmask 9216  }
  0x42   : > { %358 = vst [vmem:[#allocation2 + $0x20] sm:$0xff] %v4426_v0  ;;  %359 = vst.msk [vmem:[#allocation2 + $0x28] sm:$0xff] %vm354_vm0, %v4426_v0  ;;  %v281_v8 = vmax.f32 %v257_v3, %v261_v5  ;;  %v258_v12 = vld [vmem:[%s2898_s23 + $0x8] sm:$0xff]  ;;  %v297_v13 = vsub.f32 0.0, %v285_v4  ;;  %v284_v14 = vmax.f32 %v260_v10, %v264_v11  ;;  %v259_v15 = vld [vmem:[%s2898_s23 + $0x10] sm:$0xff]  ;;  %v300_v19 = vsub.f32 0.0, %v288_v9 }
  0x43   : > { %360 = vst [vmem:[#allocation2 + $0x30] sm:$0xff] %v4426_v0  ;;  %361 = vst.msk [vmem:[#allocation2 + $0x38] sm:$0xff] %vm354_vm0, %v4426_v0  ;;  %v262_v16 = vld [vmem:[%s2898_s23 + $0x28] sm:$0xff]  ;;  %v263_v17 = vld [vmem:[%s2898_s23 + $0x30] sm:$0xff]  ;;  %vm468_vm7 = vcmask 1047568   ;;  %vm470_vm8 = vcmask 15360  }
  0x44   : > { %362 = vst [vmem:[#allocation2 + $0x40] sm:$0xf] %v4426_v0  ;;  %367 = vst [vmem:[#allocation2 + $0x60] sm:$0xff] %v4426_v0  ;;  %v293_v18 = vsub.f32 0.0, %v281_v8  ;;  %v282_v20 = vmax.f32 %v258_v12, %v262_v16  ;;  %v283_v21 = vmax.f32 %v259_v15, %v263_v17  ;;  %v273_v22 = vld [vmem:[%s2898_s23 + $0x80] sm:$0xff]  ;;  %v276_v24 = vld [vmem:[%s2898_s23 + $0x98] sm:$0xff] }
  0x45   : > { %368 = vst.msk [vmem:[#allocation2 + $0x68] sm:$0xff] %vm354_vm0, %v4426_v0  ;;  %369 = vst [vmem:[#allocation2 + $0x70] sm:$0xff] %v4426_v0  ;;  %v277_v23 = vld [vmem:[%s2898_s23 + $0xa0] sm:$0xff]  ;;  %v313_v25 = vmul.f32 1.442695, %v297_v13  ;;  %v296_v26 = vsub.f32 0.0, %v284_v14 }
  0x46   : > { %370 = vst.msk [vmem:[#allocation2 + $0x78] sm:$0xff] %vm354_vm0, %v4426_v0  ;;  %371 = vst [vmem:[#allocation2 + $0x80] sm:$0xff] %v4426_v0  ;;  %v289_v27 = vmax.f32 %v273_v22, %v277_v23  ;;  %v280_v28 = vld [vmem:[%s2898_s23 + $0xb8] sm:$0xff]  ;;  %v266_v29 = vld [vmem:[%s2898_s23 + $0x48] sm:$0xff]  ;;  %v305_v31 = vmul.f32 1.442695, %v293_v18 }
  0x47   : > { %372 = vst.msk [vmem:[#allocation2 + $0x88] sm:$0xff] %vm354_vm0, %v4426_v0  ;;  %373 = vst [vmem:[#allocation2 + $0x90] sm:$0xf] %v4426_v0  ;;  %v267_v30 = vld [vmem:[%s2898_s23 + $0x50] sm:$0xff]  ;;  %v319_v32 = vmul.f32 1.442695, %v300_v19  ;;  %2545 = vpow2.f32 %v313_v25  ;;  %v292_v37 = vmax.f32 %v276_v24, %v280_v28 }
  0x48   : > { %375 = vst [vmem:[#allocation2 + $0xa0] sm:$0xff] %v4426_v0  ;;  %376 = vst.msk [vmem:[#allocation2 + $0xa8] sm:$0xff] %vm354_vm0, %v4426_v0  ;;  %v294_v33 = vsub.f32 0.0, %v282_v20  ;;  %v295_v34 = vsub.f32 0.0, %v283_v21  ;;  %v311_v35 = vmul.f32 1.442695, %v296_v26  ;;  %2547 = vpow2.f32 %v305_v31 }
  0x49   : > { %377 = vst [vmem:[#allocation2 + $0xb0] sm:$0xff] %v4426_v0  ;;  %378 = vst.msk [vmem:[#allocation2 + $0xb8] sm:$0xff] %vm354_vm0, %v4426_v0  ;;  %v301_v36 = vsub.f32 0.0, %v289_v27  ;;  %v270_v38 = vld [vmem:[%s2898_s23 + $0x68] sm:$0xff]  ;;  %v271_v39 = vld [vmem:[%s2898_s23 + $0x70] sm:$0xff]  ;;  %2549 = vpow2.f32 %v319_v32  ;;  %v304_v47 = vsub.f32 0.0, %v292_v37 }
  0x4a   : > { %379 = vst [vmem:[#allocation2 + $0xc0] sm:$0xff] %v4426_v0  ;;  %380 = vst.msk [vmem:[#allocation2 + $0xc8] sm:$0xff] %vm354_vm0, %v4426_v0  ;;  %v274_v40 = vld [vmem:[%s2898_s23 + $0x88] sm:$0xff]  ;;  %v307_v41 = vmul.f32 1.442695, %v294_v33  ;;  %v286_v43 = vmax.f32 %v266_v29, %v270_v38  ;;  %v275_v45 = vld [vmem:[%s2898_s23 + $0x90] sm:$0xff]  ;;  %v287_v48 = vmax.f32 %v267_v30, %v271_v39  ;;  %2551 = vpow2.f32 %v311_v35 }
  0x4b   : > { %381 = vst [vmem:[#allocation2 + $0xd0] sm:$0xff] %v4426_v0  ;;  %382 = vst.msk [vmem:[#allocation2 + $0xd8] sm:$0xff] %vm354_vm0, %v4426_v0  ;;  %v309_v42 = vmul.f32 1.442695, %v295_v34  ;;  %v278_v44 = vld [vmem:[%s2898_s23 + $0xa8] sm:$0xff]  ;;  %v279_v49 = vld [vmem:[%s2898_s23 + $0xb0] sm:$0xff] }
  0x4c   : > { %383 = vst [vmem:[#allocation2 + $0xe0] sm:$0xf] %v4426_v0  ;;  %v321_v46 = vmul.f32 1.442695, %v301_v36  ;;  %v298_v50 = vsub.f32 0.0, %v286_v43  ;;  %v290_v51 = vmax.f32 %v274_v40, %v278_v44  ;;  %v291_v52 = vmax.f32 %v275_v45, %v279_v49  ;;  %s2757_s7 = smov 126  }
  0x4d   : > { %2553 = vpow2.f32 %v307_v41  ;;  %v327_v53 = vmul.f32 1.442695, %v304_v47  ;;  %v299_v54 = vsub.f32 0.0, %v287_v48  ;;  %374 = vst.msk [vmem:[#allocation2 + $0x98] sm:$0xf] %vm363_vm1, %v4426_v0  ;;  %vm620_vm9 = vcmask 1046528  }
  0x4e   : > { %2555 = vpow2.f32 %v309_v42  ;;  %v315_v55 = vmul.f32 1.442695, %v298_v50  ;;  %v302_v56 = vsub.f32 0.0, %v290_v51  ;;  %v303_v57 = vsub.f32 0.0, %v291_v52  ;;  %364 = vst.msk [vmem:[#allocation2 + $0x48] sm:$0xf] %vm363_vm1, %v4426_v0 }
  0x4f   : > { %2557 = vpow2.f32 %v321_v46  ;;  %v317_v58 = vmul.f32 1.442695, %v299_v54  ;;  %384 = vst.msk [vmem:[#allocation2 + $0xe8] sm:$0xf] %vm363_vm1, %v4426_v0  ;;  %vm795_vm10 = vcmask 1045504   ;;  %vm934_vm11 = vcmask 1044480  }
  0x50   : > { %2559 = vpow2.f32 %v327_v53  ;;  %v323_v59 = vmul.f32 1.442695, %v302_v56  ;;  %v325_v60 = vmul.f32 1.442695, %v303_v57  ;;  %vm1091_vm12 = vcmask 1043456   ;;  %s2758_s8 = smov 127  }
  0x51   : > { %2561 = vpow2.f32 %v315_v55  ;;  %v2546_v61 = vpop.eup %2545  ;;  %s2759_s10 = smov 125   ;;  %s2760_s11 = smov 124   ;;  %vm1485_vm13 = vcmask 1039360   ;;  %vm1621_vm14 = vcmask 1031168   ;;  %vm1727_vm15 = vcmask 1022976  }
  0x52   : > { %2563 = vpow2.f32 %v317_v58  ;;  %v2548_v62 = vpop.eup %2547  ;;  %v333_v63 = vadd.f32 1.0, %v2546_v61  ;;  %vm1878_vm0 = vcmask 1014784   ;;  %vm1969_vm1 = vcmask 1047554   ;;  %s250_s29 = smul.u32 3, %s2815_s19  ;;  %p4549_p12 = scmp.ne.s32.totalorder %s4462_s26, 0 }
  0x53   : > { %2565 = vpow2.f32 %v323_v59  ;;  %v2550_v1 = vpop.eup %2549  ;;  %v329_v2 = vadd.f32 1.0, %v2548_v62  ;;  %s2471_s6 = smul.u32 96, %s2894_s13 }
  0x54   : > { %2567 = vpow2.f32 %v325_v60  ;;  %v2552_v3 = vpop.eup %2551  ;;  %v336_v4 = vadd.f32 1.0, %v2550_v1  ;;  %p251_p6 = scmp.lt.s32.totalorder %s250_s29, 5  ;;  %s2472_s9 = smul.u32 3, %s2894_s13 }
  0x55   : > { %2569 = vrcp.f32 %v333_v63  ;;  %v332_v6 = vadd.f32 1.0, %v2552_v3  ;;  %s4206_s12 = scalar_lea.vmem [#allocation6], %s2471_s6  ;;  %s4224_s14 = scalar_lea.vmem [#allocation7], %s2471_s6 }
  0x56   : > { %2571 = vrcp.f32 %v329_v2  ;;  %s4564_s29 = smov (!%p251_p6, %s250_s29), 5  ;;  %s4237_s22 = scalar_lea.vmem [#allocation9], %s2472_s9 }
  0x57   : > { %v2554_v5 = vpop.eup %2553  ;;  %2573 = vrcp.f32 %v336_v4  ;;  %s253_s5 = scalar_lea.vmem %s4421_s1, %s4564_s29  ;;  %s2467_s23 = smul.u32 1536, %s2815_s19 }
  0x58   : > { %v2556_v7 = vpop.eup %2555  ;;  %v330_v8 = vadd.f32 1.0, %v2554_v5  ;;  %2575 = vrcp.f32 %v332_v6  ;;  %s2270_s29 = sshll.u32 %s4224_s14, 4  ;;  %s2473_s28 = smul.u32 48, %s2815_s19  ;;  %s4330_s29 = int_to_ptr.vmem [resolvable:$true] %s2270_s29 }
  0x59   : > { %v2558_v9 = vpop.eup %2557  ;;  %v331_v10 = vadd.f32 1.0, %v2556_v7  ;;  %s2762_s9 = smov [#allocation6]  }
  0x5a   : > { %v2560_v11 = vpop.eup %2559  ;;  %2577 = vrcp.f32 %v330_v8  ;;  %v337_v12 = vadd.f32 1.0, %v2558_v9 }
  0x5b   : > { %v2562_v13 = vpop.eup %2561  ;;  %2579 = vrcp.f32 %v331_v10  ;;  %v340_v14 = vadd.f32 1.0, %v2560_v11 }
  0x5c   : > { %v2564_v15 = vpop.eup %2563  ;;  %2581 = vrcp.f32 %v337_v12  ;;  %v334_v16 = vadd.f32 1.0, %v2562_v13 }
  0x5d   : > { %v2566_v17 = vpop.eup %2565  ;;  %2583 = vrcp.f32 %v340_v14  ;;  %v335_v18 = vadd.f32 1.0, %v2564_v15 }
  0x5e   : > { %2585 = vrcp.f32 %v334_v16  ;;  %v2568_v19 = vpop.eup %2567  ;;  %v338_v20 = vadd.f32 1.0, %v2566_v17 }
  0x5f   : > { %2587 = vrcp.f32 %v335_v18  ;;  %v2970_v21 = vpop.eup %2569  ;;  %v339_v28 = vadd.f32 1.0, %v2568_v19 }
  0x60   : > { %4465 = vst [vmem:[#allocation13_spill] sm:$0xff] %v2970_v21  ;;  %v2972_v22 = vpop.eup %2571  ;;  %v405_v23 = vrot.slane %v2970_v21, 6  ;;  %2589 = vrcp.f32 %v338_v20 }
  0x61   : > { %4466 = vst [vmem:[#allocation14_spill] sm:$0xff] %v2972_v22  ;;  %v2975_v24 = vpop.eup %2573  ;;  %v398_v25 = vrot.slane %v2972_v22, 6  ;;  %2591 = vrcp.f32 %v339_v28 }
  0x62   : > { %4467 = vst [vmem:[#allocation15_spill] sm:$0xff] %v2975_v24  ;;  %v2978_v26 = vpop.eup %2575  ;;  %429 = vrot.lane.b32.xlu1 %v405_v23, %s2756_s25  ;;  %v410_v27 = vrot.slane %v2975_v24, 6 }
  0x63   : > { %4468 = vst [vmem:[#allocation16_spill] sm:$0xff] %v2978_v26  ;;  %419 = vrot.lane.b32.xlu0 %v398_v25, %s2756_s25  ;;  %v403_v30 = vrot.slane %v2978_v26, 6 }
  0x64   : > { %v2982_v29 = vpop.eup %2577 }
  0x65   : > { %4469 = vst [vmem:[#allocation17_spill] sm:$0xff] %v2982_v29  ;;  %v2986_v31 = vpop.eup %2579  ;;  %v399_v32 = vrot.slane %v2982_v29, 6 }
  0x66   : > { %4470 = vst [vmem:[#allocation18_spill] sm:$0xff] %v2986_v31  ;;  %v2989_v33 = vpop.eup %2581  ;;  %v401_v34 = vrot.slane %v2986_v31, 6  ;;  %437 = vrot.lane.b32.xlu1 %v410_v27, %s2756_s25 }
  0x67   : > { %4471 = vst [vmem:[#allocation19_spill] sm:$0xff] %v2989_v33  ;;  %v2992_v35 = vpop.eup %2583  ;;  %427 = vrot.lane.b32.xlu0 %v403_v30, %s2756_s25  ;;  %v412_v38 = vrot.slane %v2989_v33, 6  ;;  %v400_v48 = vsel %vm397_vm2, %v398_v25, %v399_v32 }
  0x68   : > { %4472 = vst [vmem:[#allocation20_spill] sm:$0xff] %v2992_v35  ;;  %v2995_v36 = vpop.eup %2585  ;;  %v402_v37 = vsel %vm397_vm2, %v399_v32, %v401_v34  ;;  %v404_v40 = vsel %vm397_vm2, %v401_v34, %v403_v30  ;;  %v417_v41 = vrot.slane %v2992_v35, 6 }
  0x69   : > { %4473 = vst [vmem:[#allocation21_spill] sm:$0xff] %v2995_v36  ;;  %v3000_v39 = vpop.eup %2587  ;;  %v406_v42 = vrot.slane %v2995_v36, 6 }
  0x6a   : > { %4474 = vst [vmem:[#allocation22_spill] sm:$0xff] %v3000_v39  ;;  %423 = vrot.lane.b32.xlu1 %v402_v37, %s2756_s25  ;;  %v408_v43 = vrot.slane %v3000_v39, 6  ;;  %v3008_v44 = vpop.eup %2589 }
  0x6b   : > { %439 = vrot.lane.b32.xlu0 %v412_v38, %s2756_s25  ;;  %4475 = vst [vmem:[#allocation23_spill] sm:$0xff] %v3008_v44  ;;  %v413_v46 = vrot.slane %v3008_v44, 6  ;;  %v3014_v47 = vpop.eup %2591  ;;  %v407_v51 = vsel %vm397_vm2, %v405_v23, %v406_v42 }
  0x6c   : > { %v409_v45 = vsel %vm397_vm2, %v406_v42, %v408_v43  ;;  %4476 = vst [vmem:[#allocation24_spill] sm:$0xff] %v3014_v47  ;;  %v415_v50 = vrot.slane %v3014_v47, 6  ;;  %v411_v53 = vsel %vm397_vm2, %v408_v43, %v410_v27 }
  0x6d   : > { %v414_v49 = vsel %vm397_vm2, %v412_v38, %v413_v46 }
  0x6e   : > { %425 = vrot.lane.b32.xlu1 %v404_v40, %s2756_s25  ;;  %v418_v52 = vsel %vm397_vm2, %v415_v50, %v417_v41  ;;  %v416_v54 = vsel %vm397_vm2, %v413_v46, %v415_v50 }
  0x6f   : > { %447 = vrot.lane.b32.xlu0 %v417_v41, %s2756_s25 }
  0x72   : > { %433 = vrot.lane.b32.xlu1 %v409_v45, %s2756_s25 }
  0x73   : > { %421 = vrot.lane.b32.xlu0 %v400_v48, %s2756_s25 }
  0x76   : > { %441 = vrot.lane.b32.xlu1 %v414_v49, %s2756_s25 }
  0x77   : > { %431 = vrot.lane.b32.xlu0 %v407_v51, %s2756_s25 }
  0x7a   : > { %445 = vrot.lane.b32.xlu1 %v418_v52, %s2756_s25 }
  0x7b   : > { %435 = vrot.lane.b32.xlu0 %v411_v53, %s2756_s25 }
  0x7f   : > { %443 = vrot.lane.b32.xlu0 %v416_v54, %s2756_s25  ;;  %s2253_s25 = sshll.u32 %s4206_s12, 4  ;;  %s4275_s25 = int_to_ptr.vmem [resolvable:$true] %s2253_s25 }
  0x80   : > { %s2624_s6 = scalar_lea.vmem %s4275_s25, 1536 }
  0x81   : > { %p2625_p11 = scmp.ne.s32.totalorder %s4275_s25, %s2624_s6 }
  0x83   : > { %p2626_p13 = pnand %p2625_p11, %p4549_p12 }
  0x85   : > { %p2627_p8 = pneg %p2626_p13 }
  0xd4   : > { %v430_v55 = vpop.permute.xlu1 %429 }
  0xd5   : > { %480 = vst.msk [vmem:[#allocation2 + $0x50] sm:$0xfc] %vm464_vm3, %v430_v55  ;;  %v420_v56 = vpop.permute.xlu0 %419 }
  0xd6   : > { %481 = vst.msk [vmem:[#allocation2 + $0x58] sm:$0xfc] %vm466_vm4, %v430_v55  ;;  %467 = vst.msk [vmem:[#allocation2 + $0x8] sm:$0xfc] %vm466_vm4, %v420_v56 }
  0xd7   : > { %465 = vst.msk [vmem:[#allocation2] sm:$0xfc] %vm464_vm3, %v420_v56 }
  0xd8   : > { %v438_v57 = vpop.permute.xlu1 %437 }
  0xd9   : > { %488 = vst.msk [vmem:[#allocation2 + $0x90] sm:$0x3] %vm476_vm5, %v438_v57  ;;  %v428_v58 = vpop.permute.xlu0 %427 }
  0xda   : > { %489 = vst.msk [vmem:[#allocation2 + $0x98] sm:$0x3] %vm478_vm6, %v438_v57  ;;  %479 = vst.msk [vmem:[#allocation2 + $0x48] sm:$0x3] %vm478_vm6, %v428_v58 }
  0xdb   : > { %477 = vst.msk [vmem:[#allocation2 + $0x40] sm:$0x3] %vm476_vm5, %v428_v58 }
  0xdc   : > { %v424_v59 = vpop.permute.xlu1 %423  ;;  %v508_v60 = vld [vmem:[#allocation2 + $0x50] sm:$0xff] }
  0xdd   : > { %472 = vst.msk [vmem:[#allocation2 + $0x20] sm:$0xff] %vm468_vm7, %v424_v59  ;;  %v440_v61 = vpop.permute.xlu0 %439  ;;  %v501_v63 = vld [vmem:[#allocation2 + $0x8] sm:$0xff]  ;;  %v3044_v3 = vmul.f32 0.02153928, %v508_v60 }
  0xde   : > { %473 = vst.msk [vmem:[#allocation2 + $0x28] sm:$0xff] %vm470_vm8, %v424_v59  ;;  %v500_v62 = vld [vmem:[#allocation2] sm:$0xff]  ;;  %v3046_v5 = vmul.f32 0.02153928, %v501_v63  ;;  %v549_v6 = vld [vmem:[#allocation2 + $0x8] sm:$0xfe] }
  0xdf   : > { %490 = vst.msk [vmem:[#allocation2 + $0xa0] sm:$0xfc] %vm464_vm3, %v440_v61  ;;  %v3042_v1 = vmul.f32 0.02153928, %v500_v62  ;;  %v548_v2 = vld [vmem:[#allocation2] sm:$0xfe] }
  0xe0   : > { %491 = vst.msk [vmem:[#allocation2 + $0xa8] sm:$0xfc] %vm466_vm4, %v440_v61  ;;  %v426_v4 = vpop.permute.xlu1 %425  ;;  %v723_v7 = vld [vmem:[#allocation2] sm:$0xfc]  ;;  %v3054_v14 = vmul.f32 0.09653235, %v548_v2 }
  0xe1   : > { %474 = vst.msk [vmem:[#allocation2 + $0x30] sm:$0xff] %vm468_vm7, %v426_v4  ;;  %v551_v9 = vld [vmem:[#allocation2 + $0x48] sm:$0x1]  ;;  %v448_v11 = vpop.permute.xlu0 %447  ;;  %v3058_v16 = vmul.f32 0.09653235, %v549_v6 }
  0xe2   : > { %475 = vst.msk [vmem:[#allocation2 + $0x38] sm:$0xff] %vm470_vm8, %v426_v4  ;;  %v550_v8 = vld [vmem:[#allocation2 + $0x40] sm:$0x1]  ;;  %v726_v13 = vld [vmem:[#allocation2 + $0x48] sm:$0x3] }
  0xe3   : > { %v725_v10 = vld [vmem:[#allocation2 + $0x40] sm:$0x3]  ;;  %v3050_v12 = vmul.f32 0.09653235, %v550_v8  ;;  %498 = vst.msk [vmem:[#allocation2 + $0xe0] sm:$0x3] %vm476_vm5, %v448_v11 }
  0xe4   : > { %499 = vst.msk [vmem:[#allocation2 + $0xe8] sm:$0x3] %vm478_vm6, %v448_v11  ;;  %v3056_v15 = vmul.f32 0.09653235, %v551_v9  ;;  %v3060_v17 = vmul.f32 0.15915494, %v723_v7  ;;  %v434_v23 = vpop.permute.xlu1 %433 }
  0xe5   : > { %v504_v18 = vld [vmem:[#allocation2 + $0x20] sm:$0xff]  ;;  %v3062_v19 = vmul.f32 0.15915494, %v725_v10  ;;  %v3064_v20 = vmul.f32 0.15915494, %v726_v13  ;;  %v635_v30 = vrot.slane %v3050_v12, 1  ;;  %v422_v32 = vpop.permute.xlu0 %421 }
  0xe6   : > { %v516_v25 = vld [vmem:[#allocation2 + $0xa0] sm:$0xff]  ;;  %484 = vst.msk [vmem:[#allocation2 + $0x70] sm:$0xff] %vm468_vm7, %v434_v23  ;;  %v3071_v38 = vmul.f32 0.02153928, %v504_v18  ;;  %469 = vst.msk [vmem:[#allocation2 + $0x10] sm:$0xff] %vm468_vm7, %v422_v32  ;;  %v505_v48 = vld [vmem:[#allocation2 + $0x28] sm:$0xff] }
  0xe7   : > { %v517_v27 = vld [vmem:[#allocation2 + $0xa8] sm:$0xff]  ;;  %v556_v28 = vld [vmem:[#allocation2 + $0xa0] sm:$0xfe]  ;;  %485 = vst.msk [vmem:[#allocation2 + $0x78] sm:$0xff] %vm470_vm8, %v434_v23  ;;  %v3069_v34 = vmul.f32 0.02153928, %v516_v25 }
  0xe8   : > { %v557_v37 = vld [vmem:[#allocation2 + $0xa8] sm:$0xfe]  ;;  %471 = vst.msk [vmem:[#allocation2 + $0x18] sm:$0xff] %vm470_vm8, %v422_v32  ;;  %v3075_v40 = vmul.f32 0.09653235, %v556_v28  ;;  %v442_v49 = vpop.permute.xlu1 %441  ;;  %v637_v57 = vrot.slane %v3056_v15, 1 }
  0xe9   : > { %v3077_v41 = vmul.f32 0.09653235, %v557_v37  ;;  %v731_v42 = vld [vmem:[#allocation2 + $0xa0] sm:$0xfc]  ;;  %v732_v43 = vld [vmem:[#allocation2 + $0xa8] sm:$0xfc]  ;;  %v432_v53 = vpop.permute.xlu0 %431 }
  0xea   : > { %v3079_v45 = vmul.f32 0.15915494, %v731_v42  ;;  %v906_v46 = vld [vmem:[#allocation2 + $0xa0] sm:$0xf8]  ;;  %v3081_v50 = vmul.f32 0.02153928, %v517_v27 }
  0xeb   : > { %v3083_v51 = vmul.f32 0.15915494, %v732_v43  ;;  %v907_v52 = vld [vmem:[#allocation2 + $0xa8] sm:$0xf8]  ;;  %492 = vst.msk [vmem:[#allocation2 + $0xb0] sm:$0xff] %vm468_vm7, %v442_v49  ;;  %482 = vst.msk [vmem:[#allocation2 + $0x60] sm:$0xff] %vm468_vm7, %v432_v53 }
  0xec   : > { %493 = vst.msk [vmem:[#allocation2 + $0xb8] sm:$0xff] %vm470_vm8, %v442_v49  ;;  %v3088_v55 = vmul.f32 0.09653235, %v906_v46  ;;  %v3090_v56 = vmul.f32 0.09653235, %v907_v52  ;;  %483 = vst.msk [vmem:[#allocation2 + $0x68] sm:$0xff] %vm470_vm8, %v432_v53  ;;  %v446_v7 = vpop.permute.xlu1 %445 }
  0xed   : > { %v506_v62 = vld [vmem:[#allocation2 + $0x30] sm:$0xff]  ;;  %v3101_v4 = vmul.f32 0.02153928, %v505_v48  ;;  %v3103_v6 = vmul.f32 0.09653235, %v504_v18  ;;  %496 = vst.msk [vmem:[#allocation2 + $0xd0] sm:$0xff] %vm468_vm7, %v446_v7  ;;  %v436_v13 = vpop.permute.xlu0 %435 }
  0xee   : > { %v3105_v8 = vmul.f32 0.09653235, %v505_v48  ;;  %v3107_v9 = vmul.f32 0.15915494, %v504_v18  ;;  %v3109_v10 = vmul.f32 0.15915494, %v505_v48 }
  0xef   : > { %v900_v11 = vld [vmem:[#allocation2 + $0x40] sm:$0x7]  ;;  %497 = vst.msk [vmem:[#allocation2 + $0xd8] sm:$0xff] %vm470_vm8, %v446_v7  ;;  %v4431_v15 = vrot.slane %v3103_v6, 1  ;;  %v4435_v23 = vrot.slane %v3103_v6, 3  ;;  %v507_v27 = vld [vmem:[#allocation2 + $0x38] sm:$0xff] }
  0xf0   : > { %v3116_v28 = vmul.f32 0.02153928, %v506_v62  ;;  %486 = vst.msk [vmem:[#allocation2 + $0x80] sm:$0xff] %vm468_vm7, %v436_v13  ;;  %v4430_v18 = vrot.slane %v3105_v8, 1  ;;  %v4428_v32 = vrot.slane %v3107_v9, 2  ;;  %v4429_v37 = vrot.slane %v3109_v10, 2 }
  0xf1   : > { %487 = vst.msk [vmem:[#allocation2 + $0x88] sm:$0xff] %vm470_vm8, %v436_v13  ;;  %v4434_v42 = vrot.slane %v3105_v8, 3  ;;  %v901_v43 = vld [vmem:[#allocation2 + $0x48] sm:$0x7]  ;;  %v531_v46 = vmul.f32 0.02153928, %v507_v27  ;;  %v444_v13 = vpop.permute.xlu0 %443 }
  0xf2   : > { %v566_v48 = vmul.f32 0.09653235, %v506_v62  ;;  %v567_v49 = vmul.f32 0.09653235, %v507_v27  ;;  %v741_v52 = vmul.f32 0.15915494, %v506_v62 }
  0xf3   : > { %v742_v53 = vmul.f32 0.15915494, %v507_v27  ;;  %v810_v7 = vrot.slane %v3062_v19, 2  ;;  %v812_v0 = vrot.slane %v3064_v20, 2  ;;  %v912_v60 = vmul.f32 0.09653235, %v900_v11 }
  0xf4   : > { %v631_v2 = vrot.slane %v566_v48, 1  ;;  %v633_v63 = vrot.slane %v567_v49, 1  ;;  %v913_v59 = vmul.f32 0.09653235, %v901_v43  ;;  %494 = vst.msk [vmem:[#allocation2 + $0xc0] sm:$0xff] %vm468_vm7, %v444_v13  ;;  %v806_v58 = vrot.slane %v741_v52, 2 }
  0xf5   : > { %495 = vst.msk [vmem:[#allocation2 + $0xc8] sm:$0xff] %vm470_vm8, %v444_v13  ;;  %v808_v54 = vrot.slane %v742_v53, 2  ;;  %v945_v25 = vrot.slane %v566_v48, 3  ;;  %v947_v61 = vrot.slane %v567_v49, 3 }
  0xf6   : > { %v632_v19 = vsel %vm620_vm9, %v4431_v15, %v631_v2  ;;  %v634_v20 = vsel %vm620_vm9, %v4430_v18, %v633_v63  ;;  %v636_v62 = vsel %vm620_vm9, %v631_v2, %v635_v30  ;;  %v638_v11 = vsel %vm620_vm9, %v633_v63, %v637_v57  ;;  %v1039_v57 = vld [vmem:[#allocation2 + $0x40] sm:$0xf]  ;;  %v1040_v63 = vld [vmem:[#allocation2 + $0x48] sm:$0xf] }
  0xf7   : > { %v703_v27 = vadd.f32 %v632_v19, %v3071_v38  ;;  %v704_v43 = vadd.f32 %v634_v20, %v3101_v4  ;;  %v705_v48 = vadd.f32 %v636_v62, %v3116_v28  ;;  %v706_v49 = vadd.f32 %v638_v11, %v531_v46  ;;  %v733_v18 = vld [vmem:[#allocation2 + $0xe0] sm:$0x3]  ;;  %v734_v15 = vld [vmem:[#allocation2 + $0xe8] sm:$0x3] }
  0xf8   : > { %v807_v52 = vsel %vm795_vm10, %v4428_v32, %v806_v58  ;;  %v809_v53 = vsel %vm795_vm10, %v4429_v37, %v808_v54  ;;  %v811_v12 = vsel %vm795_vm10, %v806_v58, %v810_v7  ;;  %v813_v30 = vsel %vm795_vm10, %v808_v54, %v812_v0 }
  0xf9   : > { %v878_v2 = vadd.f32 %v807_v52, %v703_v27  ;;  %v879_v13 = vadd.f32 %v809_v53, %v704_v43  ;;  %v880_v19 = vadd.f32 %v811_v12, %v705_v48  ;;  %v881_v20 = vadd.f32 %v813_v30, %v706_v49 }
  0xfa   : > { %v946_v62 = vsel %vm934_vm11, %v4435_v23, %v945_v25  ;;  %v948_v11 = vsel %vm934_vm11, %v4434_v42, %v947_v61  ;;  %v949_v32 = vrot.slane %v912_v60, 3  ;;  %v951_v37 = vrot.slane %v913_v59, 3 }
  0xfb   : > { %v1017_v58 = vadd.f32 %v946_v62, %v878_v2  ;;  %v1018_v7 = vadd.f32 %v948_v11, %v879_v13  ;;  %v1051_v0 = vmul.f32 0.02153928, %v1039_v57  ;;  %v1052_v54 = vmul.f32 0.02153928, %v1040_v63  ;;  %v724_v13 = vld [vmem:[#allocation2 + $0x8] sm:$0xfc] }
  0xfc   : > { %v950_v27 = vsel %vm934_vm11, %v945_v25, %v949_v32  ;;  %v952_v43 = vsel %vm934_vm11, %v947_v61, %v951_v37  ;;  %v1102_v48 = vrot.slane %v3116_v28, 4  ;;  %v1104_v49 = vrot.slane %v531_v46, 4  ;;  %v908_v46 = vld [vmem:[#allocation2 + $0xe0] sm:$0x7]  ;;  %v909_v11 = vld [vmem:[#allocation2 + $0xe8] sm:$0x7] }
  0xfd   : > { %v1019_v52 = vadd.f32 %v950_v27, %v880_v19  ;;  %v1020_v53 = vadd.f32 %v952_v43, %v881_v20  ;;  %v1106_v12 = vrot.slane %v1051_v0, 4  ;;  %v1108_v30 = vrot.slane %v1052_v54, 4  ;;  %v898_v19 = vld [vmem:[#allocation2] sm:$0xf8]  ;;  %v899_v0 = vld [vmem:[#allocation2 + $0x8] sm:$0xf8] }
  0xfe   : > { %v4477_v60 = vrot.slane %v3071_v38, 4  ;;  %v4478_v2 = vrot.slane %v3101_v4, 4  ;;  %v3164_v63 = vmul.f32 0.15915494, %v733_v18  ;;  %v3166_v25 = vmul.f32 0.15915494, %v734_v15 }
  0xff   : > { %v1107_v61 = vsel %vm1091_vm12, %v1102_v48, %v1106_v12  ;;  %v1109_v28 = vsel %vm1091_vm12, %v1104_v49, %v1108_v30  ;;  %v1037_v54 = vld [vmem:[#allocation2] sm:$0xf0]  ;;  %v1038_v43 = vld [vmem:[#allocation2 + $0x8] sm:$0xf0]  ;;  %v3178_v12 = vmul.f32 0.09653235, %v908_v46 }
 0x100   : > { %v1103_v59 = vsel %vm1091_vm12, %v4477_v60, %v1102_v48  ;;  %v1105_v57 = vsel %vm1091_vm12, %v4478_v2, %v1104_v49  ;;  %v1176_v20 = vadd.f32 %v1107_v61, %v1019_v52  ;;  %v1177_v62 = vadd.f32 %v1109_v28, %v1020_v53  ;;  %v502_v48 = vld [vmem:[#allocation2 + $0x10] sm:$0xff]  ;;  %v503_v30 = vld [vmem:[#allocation2 + $0x18] sm:$0xff] }
 0x101   : > { %v3170_v32 = vadd.f32 %v1103_v59, %v1017_v58  ;;  %v3172_v37 = vadd.f32 %v1105_v57, %v1018_v7  ;;  %v3180_v52 = vmul.f32 0.09653235, %v909_v11  ;;  %v621_v53 = vrot.slane %v3054_v14, 1 }
 0x102   : > { %v1228_v58 = vrot.slane %v1176_v20, 6  ;;  %v1230_v49 = vrot.slane %v1177_v62, 6  ;;  %v624_v60 = vrot.slane %v3058_v16, 1  ;;  %v736_v59 = vmul.f32 0.15915494, %v724_v13 }
 0x103   : > { %v4433_v18 = vrot.slane %v3170_v32, 6  ;;  %v4432_v15 = vrot.slane %v3172_v37, 6  ;;  %v910_v61 = vmul.f32 0.09653235, %v898_v19  ;;  %v911_v28 = vmul.f32 0.09653235, %v899_v0 }
 0x104   : > { %1298 = vst.msk [vmem:[#allocation2 + $0x40] sm:$0x3] %vm476_vm5, %v1228_v58  ;;  %v796_v14 = vrot.slane %v3060_v17, 2  ;;  %v799_v16 = vrot.slane %v736_v59, 2  ;;  %v1049_v46 = vmul.f32 0.02153928, %v1037_v54 }
 0x105   : > { %v1229_v2 = vsel %vm397_vm2, %v4433_v18, %v1228_v58  ;;  %v1231_v57 = vsel %vm397_vm2, %v4432_v15, %v1230_v49  ;;  %1299 = vst.msk [vmem:[#allocation2 + $0x48] sm:$0x3] %vm478_vm6, %v1230_v49  ;;  %v1050_v13 = vmul.f32 0.02153928, %v1038_v43  ;;  %v935_v20 = vrot.slane %v910_v61, 3 }
 0x106   : > { %1296 = vst.msk [vmem:[#allocation2 + $0x30] sm:$0xff] %vm468_vm7, %v1229_v2  ;;  %v938_v62 = vrot.slane %v911_v28, 3  ;;  %v526_v11 = vmul.f32 0.02153928, %v502_v48  ;;  %v527_v7 = vmul.f32 0.02153928, %v503_v30 }
 0x107   : > { %1297 = vst.msk [vmem:[#allocation2 + $0x38] sm:$0xff] %vm470_vm8, %v1231_v57  ;;  %v1092_v27 = vrot.slane %v1049_v46, 4  ;;  %v1095_v15 = vrot.slane %v1050_v13, 4  ;;  %v562_v58 = vmul.f32 0.09653235, %v502_v48  ;;  %v4479_v46 = vrot.slane %v3103_v6, 1 }
 0x108   : > { %v563_v18 = vmul.f32 0.09653235, %v503_v30  ;;  %v737_v49 = vmul.f32 0.15915494, %v502_v48  ;;  %v738_v19 = vmul.f32 0.15915494, %v503_v30 }
 0x109   : > { %v1093_v0 = vrot.slane %v526_v11, 4  ;;  %v1096_v42 = vrot.slane %v527_v7, 4  ;;  %v622_v2 = vrot.slane %v562_v58, 1  ;;  %v936_v57 = vrot.slane %v562_v58, 3 }
 0x10a   : > { %v625_v23 = vrot.slane %v563_v18, 1  ;;  %v939_v24 = vrot.slane %v563_v18, 3  ;;  %v797_v17 = vrot.slane %v737_v49, 2  ;;  %v800_v59 = vrot.slane %v738_v19, 2 }
 0x10b   : > { %v1094_v54 = vsel %vm1091_vm12, %v1092_v27, %v1093_v0  ;;  %v1097_v43 = vsel %vm1091_vm12, %v1095_v15, %v1096_v42  ;;  %v623_v61 = vsel %vm620_vm9, %v621_v53, %v622_v2  ;;  %v628_v48 = vsel %vm620_vm9, %v622_v2, %v4479_v46 }
 0x10c   : > { %v626_v28 = vsel %vm620_vm9, %v624_v60, %v625_v23  ;;  %v4480_v30 = vrot.slane %v3105_v8, 1  ;;  %v699_v18 = vadd.f32 %v623_v61, %v3042_v1  ;;  %v701_v49 = vadd.f32 %v628_v48, %v526_v11  ;;  %v509_v61 = vld [vmem:[#allocation2 + $0x58] sm:$0xff]  ;;  %v512_v48 = vld [vmem:[#allocation2 + $0x70] sm:$0xff] }
 0x10d   : > { %v700_v58 = vadd.f32 %v626_v28, %v3046_v5  ;;  %v798_v15 = vsel %vm795_vm10, %v796_v14, %v797_v17  ;;  %v801_v53 = vsel %vm795_vm10, %v799_v16, %v800_v59  ;;  %v4481_v60 = vrot.slane %v3107_v9, 2 }
 0x10e   : > { %v630_v13 = vsel %vm620_vm9, %v625_v23, %v4480_v30  ;;  %v4482_v2 = vrot.slane %v3109_v10, 2  ;;  %v874_v39 = vadd.f32 %v798_v15, %v699_v18  ;;  %v937_v5 = vsel %vm934_vm11, %v935_v20, %v936_v57  ;;  %v553_v18 = vld [vmem:[#allocation2 + $0x58] sm:$0xfe] }
 0x10f   : > { %v702_v27 = vadd.f32 %v630_v13, %v527_v7  ;;  %v803_v19 = vsel %vm795_vm10, %v797_v17, %v4481_v60  ;;  %v875_v23 = vadd.f32 %v801_v53, %v700_v58  ;;  %v940_v7 = vsel %vm934_vm11, %v938_v62, %v939_v24  ;;  %v552_v13 = vld [vmem:[#allocation2 + $0x50] sm:$0xfe]  ;;  %v513_v15 = vld [vmem:[#allocation2 + $0x78] sm:$0xff] }
 0x110   : > { %v805_v46 = vsel %vm795_vm10, %v800_v59, %v4482_v2  ;;  %v876_v30 = vadd.f32 %v803_v19, %v701_v49  ;;  %v4483_v14 = vrot.slane %v3103_v6, 3  ;;  %v4484_v9 = vrot.slane %v3105_v8, 3  ;;  %v727_v53 = vld [vmem:[#allocation2 + $0x50] sm:$0xfc]  ;;  %v728_v60 = vld [vmem:[#allocation2 + $0x58] sm:$0xfc] }
 0x111   : > { %v877_v1 = vadd.f32 %v805_v46, %v702_v27  ;;  %v1013_v10 = vadd.f32 %v937_v5, %v874_v39  ;;  %v1014_v17 = vadd.f32 %v940_v7, %v875_v23  ;;  %v4485_v58 = vrot.slane %v3071_v38, 4  ;;  %v902_v23 = vld [vmem:[#allocation2 + $0x50] sm:$0xf8] }
 0x112   : > { %v942_v16 = vsel %vm934_vm11, %v936_v57, %v4483_v14  ;;  %v944_v11 = vsel %vm934_vm11, %v939_v24, %v4484_v9  ;;  %v4486_v62 = vrot.slane %v3101_v4, 4  ;;  %v3229_v57 = vmul.f32 0.02153928, %v509_v61 }
 0x113   : > { %v1015_v59 = vadd.f32 %v942_v16, %v876_v30  ;;  %v1016_v28 = vadd.f32 %v944_v11, %v877_v1  ;;  %v1099_v20 = vsel %vm1091_vm12, %v1093_v0, %v4485_v58  ;;  %v3231_v8 = vmul.f32 0.02153928, %v512_v48  ;;  %v903_v11 = vld [vmem:[#allocation2 + $0x58] sm:$0xf8] }
 0x114   : > { %v1101_v6 = vsel %vm1091_vm12, %v1096_v42, %v4486_v62  ;;  %v1170_v24 = vadd.f32 %v1094_v54, %v1013_v10  ;;  %v1171_v39 = vadd.f32 %v1097_v43, %v1014_v17  ;;  %v3233_v19 = vmul.f32 0.02153928, %v513_v15  ;;  %v1041_v10 = vld [vmem:[#allocation2 + $0x50] sm:$0xf0]  ;;  %v1042_v17 = vld [vmem:[#allocation2 + $0x58] sm:$0xf0] }
 0x115   : > { %v1172_v49 = vadd.f32 %v1099_v20, %v1015_v59  ;;  %v1173_v27 = vadd.f32 %v1101_v6, %v1016_v28  ;;  %v3235_v38 = vmul.f32 0.09653235, %v552_v13  ;;  %v3237_v0 = vmul.f32 0.09653235, %v553_v18  ;;  %v510_v13 = vld [vmem:[#allocation2 + $0x60] sm:$0xff] }
 0x116   : > { %v1218_v4 = vrot.slane %v1170_v24, 6  ;;  %v1219_v2 = vrot.slane %v1171_v39, 6  ;;  %v3240_v54 = vmul.f32 0.09653235, %v512_v48  ;;  %v3242_v43 = vmul.f32 0.09653235, %v513_v15 }
 0x117   : > { %v1220_v42 = vrot.slane %v1172_v49, 6  ;;  %v1222_v46 = vrot.slane %v1173_v27, 6  ;;  %v639_v1 = vrot.slane %v3235_v38, 1  ;;  %v4487_v7 = vrot.slane %v3170_v32, 6  ;;  %v511_v49 = vld [vmem:[#allocation2 + $0x68] sm:$0xff] }
 0x118   : > { %v4488_v16 = vrot.slane %v3172_v37, 6  ;;  %1290 = vst.msk [vmem:[#allocation2] sm:$0xfc] %vm464_vm3, %v1218_v4  ;;  %v642_v32 = vrot.slane %v3237_v0, 1  ;;  %v4444_v37 = vrot.slane %v3240_v54, 1  ;;  %v4438_v62 = vrot.slane %v3242_v43, 1 }
 0x119   : > { %v1221_v61 = vsel %vm397_vm2, %v1218_v4, %v1220_v42  ;;  %v1223_v5 = vsel %vm397_vm2, %v1219_v2, %v1222_v46  ;;  %v1225_v14 = vsel %vm397_vm2, %v1220_v42, %v4487_v7  ;;  %1291 = vst.msk [vmem:[#allocation2 + $0x8] sm:$0xfc] %vm466_vm4, %v1219_v2  ;;  %v745_v59 = vmul.f32 0.15915494, %v727_v53 }
 0x11a   : > { %v1227_v9 = vsel %vm397_vm2, %v1222_v46, %v4488_v16  ;;  %1292 = vst.msk [vmem:[#allocation2 + $0x10] sm:$0xff] %vm468_vm7, %v1221_v61  ;;  %1294 = vst.msk [vmem:[#allocation2 + $0x20] sm:$0xff] %vm468_vm7, %v1225_v14  ;;  %v746_v28 = vmul.f32 0.15915494, %v728_v60  ;;  %v3261_v18 = vmul.f32 0.15915494, %v512_v48 }
 0x11b   : > { %1293 = vst.msk [vmem:[#allocation2 + $0x18] sm:$0xff] %vm470_vm8, %v1223_v5  ;;  %1295 = vst.msk [vmem:[#allocation2 + $0x28] sm:$0xff] %vm470_vm8, %v1227_v9  ;;  %v3263_v58 = vmul.f32 0.15915494, %v513_v15  ;;  %v914_v20 = vmul.f32 0.09653235, %v902_v23 }
 0x11c   : > { %v814_v6 = vrot.slane %v745_v59, 2  ;;  %v817_v24 = vrot.slane %v746_v28, 2  ;;  %v915_v39 = vmul.f32 0.09653235, %v903_v11  ;;  %v4443_v27 = vrot.slane %v3261_v18, 2 }
 0x11d   : > { %v4440_v38 = vrot.slane %v3263_v58, 2  ;;  %v953_v0 = vrot.slane %v914_v20, 3  ;;  %v4439_v53 = vrot.slane %v3240_v54, 3  ;;  %v1053_v4 = vmul.f32 0.02153928, %v1041_v10 }
 0x11e   : > { %v956_v60 = vrot.slane %v915_v39, 3  ;;  %v1054_v15 = vmul.f32 0.02153928, %v1042_v17  ;;  %v534_v46 = vmul.f32 0.02153928, %v510_v13  ;;  %v4496_v21 = vrot.slane %v3263_v58, 2 }
 0x11f   : > { %v535_v23 = vmul.f32 0.02153928, %v511_v49  ;;  %v1110_v61 = vrot.slane %v1053_v4, 4  ;;  %v572_v7 = vmul.f32 0.09653235, %v510_v13  ;;  %v4497_v58 = vrot.slane %v3240_v54, 3 }
 0x120   : > { %v1113_v5 = vrot.slane %v1054_v15, 4  ;;  %v573_v14 = vmul.f32 0.09653235, %v511_v49  ;;  %v747_v16 = vmul.f32 0.15915494, %v510_v13  ;;  %v1111_v11 = vrot.slane %v534_v46, 4 }
 0x121   : > { %v748_v9 = vmul.f32 0.15915494, %v511_v49  ;;  %v1114_v59 = vrot.slane %v535_v23, 4  ;;  %v640_v28 = vrot.slane %v572_v7, 1  ;;  %v954_v39 = vrot.slane %v572_v7, 3 }
 0x122   : > { %v643_v20 = vrot.slane %v573_v14, 1  ;;  %v957_v30 = vrot.slane %v573_v14, 3  ;;  %v3272_v10 = vld [vmem:[#allocation2 + $0x8] sm:$0xfc]  ;;  %v815_v17 = vrot.slane %v747_v16, 2  ;;  %v1112_v42 = vsel %vm1091_vm12, %v1110_v61, %v1111_v11 }
 0x123   : > { %v818_v2 = vrot.slane %v748_v9, 2  ;;  %v1115_v48 = vsel %vm1091_vm12, %v1113_v5, %v1114_v59  ;;  %1563 = vrot.lane.b32.xlu0 %v3272_v10, %s2757_s7  ;;  %v3278_v13 = vld [vmem:[#allocation2] sm:$0xfc]  ;;  %v641_v49 = vsel %vm620_vm9, %v639_v1, %v640_v28  ;;  %v646_v15 = vsel %vm620_vm9, %v640_v28, %v4444_v37 }
 0x124   : > { %v644_v4 = vsel %vm620_vm9, %v642_v32, %v643_v20  ;;  %v648_v61 = vsel %vm620_vm9, %v643_v20, %v4438_v62  ;;  %1561 = vrot.lane.b32.xlu1 %v3278_v13, %s2757_s7  ;;  %v707_v5 = vadd.f32 %v641_v49, %v3044_v3  ;;  %v709_v14 = vadd.f32 %v646_v15, %v534_v46  ;;  %v3300_v20 = vld [vmem:[#allocation2 + $0x48] sm:$0x3]  ;;  %v554_v46 = vld [vmem:[#allocation2 + $0x90] sm:$0x1] }
 0x125   : > { %v708_v7 = vadd.f32 %v644_v4, %v3229_v57  ;;  %v710_v16 = vadd.f32 %v648_v61, %v535_v23  ;;  %v816_v1 = vsel %vm795_vm10, %v814_v6, %v815_v17  ;;  %v819_v32 = vsel %vm795_vm10, %v817_v24, %v818_v2  ;;  %v555_v23 = vld [vmem:[#allocation2 + $0x98] sm:$0x1]  ;;  %v3304_v6 = vld [vmem:[#allocation2 + $0x40] sm:$0x3] }
 0x126   : > { %v821_v9 = vsel %vm795_vm10, %v815_v17, %v4443_v27  ;;  %v823_v28 = vsel %vm795_vm10, %v818_v2, %v4440_v38  ;;  %v882_v62 = vadd.f32 %v816_v1, %v707_v5  ;;  %v955_v24 = vsel %vm934_vm11, %v953_v0, %v954_v39  ;;  %v730_v1 = vld [vmem:[#allocation2 + $0x98] sm:$0x3] }
 0x127   : > { %v883_v3 = vadd.f32 %v819_v32, %v708_v7  ;;  %v884_v49 = vadd.f32 %v821_v9, %v709_v14  ;;  %v885_v57 = vadd.f32 %v823_v28, %v710_v16  ;;  %1579 = vrot.lane.b32.xlu0 %v3300_v20, %s2757_s7  ;;  %v958_v17 = vsel %vm934_vm11, %v956_v60, %v957_v30  ;;  %v729_v16 = vld [vmem:[#allocation2 + $0x90] sm:$0x3] }
 0x128   : > { %v960_v2 = vsel %vm934_vm11, %v954_v39, %v4439_v53  ;;  %v4489_v4 = vrot.slane %v3242_v43, 3  ;;  %1577 = vrot.lane.b32.xlu1 %v3304_v6, %s2757_s7  ;;  %v1021_v61 = vadd.f32 %v955_v24, %v882_v62  ;;  %v4490_v0 = vrot.slane %v3231_v8, 4 }
 0x129   : > { %v1022_v5 = vadd.f32 %v958_v17, %v883_v3  ;;  %v1023_v7 = vadd.f32 %v960_v2, %v884_v49  ;;  %v4491_v32 = vrot.slane %v3233_v19, 4  ;;  %v578_v9 = vmul.f32 0.09653235, %v554_v46  ;;  %v905_v3 = vld [vmem:[#allocation2 + $0x98] sm:$0x7] }
 0x12a   : > { %v962_v15 = vsel %vm934_vm11, %v957_v30, %v4489_v4  ;;  %v1117_v60 = vsel %vm1091_vm12, %v1111_v11, %v4490_v0  ;;  %v579_v28 = vmul.f32 0.09653235, %v555_v23  ;;  %v904_v30 = vld [vmem:[#allocation2 + $0x90] sm:$0x7]  ;;  %v1178_v4 = vadd.f32 %v1112_v42, %v1021_v61  ;;  %v514_v42 = vld [vmem:[#allocation2 + $0x80] sm:$0xff] }
 0x12b   : > { %v1024_v14 = vadd.f32 %v962_v15, %v885_v57  ;;  %v1119_v39 = vsel %vm1091_vm12, %v1114_v59, %v4491_v32  ;;  %v1179_v53 = vadd.f32 %v1115_v48, %v1022_v5  ;;  %v3322_v38 = vadd.f32 %v1117_v60, %v1023_v7  ;;  %v1043_v49 = vld [vmem:[#allocation2 + $0x90] sm:$0xf]  ;;  %v1044_v57 = vld [vmem:[#allocation2 + $0x98] sm:$0xf]  ;;  %v515_v48 = vld [vmem:[#allocation2 + $0x88] sm:$0xff] }
 0x12c   : > { %v653_v17 = vrot.slane %v578_v9, 1  ;;  %v753_v11 = vmul.f32 0.15915494, %v729_v16  ;;  %v754_v2 = vmul.f32 0.15915494, %v730_v1  ;;  %v1232_v15 = vrot.slane %v1178_v4, 6 }
 0x12d   : > { %v3324_v62 = vadd.f32 %v1119_v39, %v1024_v14  ;;  %v1233_v0 = vrot.slane %v1179_v53, 6  ;;  %v4442_v59 = vrot.slane %v3322_v38, 6  ;;  %v655_v23 = vrot.slane %v579_v28, 1 }
 0x12e   : > { %v828_v61 = vrot.slane %v753_v11, 2  ;;  %v916_v5 = vmul.f32 0.09653235, %v904_v30  ;;  %v917_v7 = vmul.f32 0.09653235, %v905_v3  ;;  %v830_v60 = vrot.slane %v754_v2, 2 }
 0x12f   : > { %v4441_v46 = vrot.slane %v3324_v62, 6  ;;  %v1235_v14 = vsel %vm397_vm2, %v1232_v15, %v4442_v59  ;;  %1300 = vst.msk [vmem:[#allocation2 + $0x50] sm:$0xfc] %vm464_vm3, %v1232_v15  ;;  %v1055_v53 = vmul.f32 0.02153928, %v1043_v49  ;;  %v4492_v2 = vrot.slane %v3231_v8, 4 }
 0x130   : > { %1301 = vst.msk [vmem:[#allocation2 + $0x58] sm:$0xfc] %vm466_vm4, %v1233_v0  ;;  %v1056_v1 = vmul.f32 0.02153928, %v1044_v57  ;;  %v967_v32 = vrot.slane %v916_v5, 3  ;;  %v969_v28 = vrot.slane %v917_v7, 3 }
 0x131   : > { %v1237_v16 = vsel %vm397_vm2, %v1233_v0, %v4441_v46  ;;  %1302 = vst.msk [vmem:[#allocation2 + $0x60] sm:$0xff] %vm468_vm7, %v1235_v14  ;;  %v538_v39 = vmul.f32 0.02153928, %v514_v42  ;;  %v539_v9 = vmul.f32 0.02153928, %v515_v48  ;;  %v1124_v30 = vrot.slane %v1055_v53, 4 }
 0x132   : > { %1303 = vst.msk [vmem:[#allocation2 + $0x68] sm:$0xff] %vm470_vm8, %v1237_v16  ;;  %v576_v4 = vmul.f32 0.09653235, %v514_v42  ;;  %v577_v3 = vmul.f32 0.09653235, %v515_v48  ;;  %v1126_v11 = vrot.slane %v1056_v1, 4 }
 0x133   : > { %v751_v24 = vmul.f32 0.15915494, %v514_v42  ;;  %v752_v46 = vmul.f32 0.15915494, %v515_v48  ;;  %v1120_v15 = vrot.slane %v538_v39, 4  ;;  %v1122_v57 = vrot.slane %v539_v9, 4 }
 0x134   : > { %v649_v59 = vrot.slane %v576_v4, 1  ;;  %v651_v0 = vrot.slane %v577_v3, 1  ;;  %v963_v49 = vrot.slane %v576_v4, 3  ;;  %v965_v37 = vrot.slane %v577_v3, 3 }
 0x135   : > { %v824_v27 = vrot.slane %v751_v24, 2  ;;  %v826_v14 = vrot.slane %v752_v46, 2  ;;  %v1121_v5 = vsel %vm1091_vm12, %v4492_v2, %v1120_v15  ;;  %v4493_v7 = vrot.slane %v3240_v54, 1 }
 0x136   : > { %v4494_v53 = vrot.slane %v3242_v43, 1  ;;  %v654_v48 = vsel %vm620_vm9, %v649_v59, %v653_v17  ;;  %v656_v1 = vsel %vm620_vm9, %v651_v0, %v655_v23  ;;  %v4495_v2 = vrot.slane %v3261_v18, 2  ;;  %v518_v18 = vld [vmem:[#allocation2 + $0xb0] sm:$0xff] }
 0x137   : > { %v650_v16 = vsel %vm620_vm9, %v4493_v7, %v649_v59  ;;  %v713_v4 = vadd.f32 %v654_v48, %v538_v39  ;;  %v714_v3 = vadd.f32 %v656_v1, %v539_v9  ;;  %v3352_v36 = vld [vmem:[#allocation2 + $0x58] sm:$0xfc]  ;;  %v829_v17 = vsel %vm795_vm10, %v824_v27, %v828_v61 }
 0x138   : > { %v652_v42 = vsel %vm620_vm9, %v4494_v53, %v651_v0  ;;  %v711_v24 = vadd.f32 %v650_v16, %v3231_v8  ;;  %v825_v7 = vsel %vm795_vm10, %v4495_v2, %v824_v27  ;;  %v827_v53 = vsel %vm795_vm10, %v4496_v21, %v826_v14  ;;  %1583 = vrot.lane.b32.xlu0 %v3352_v36, %s2757_s7  ;;  %v3364_v8 = vld [vmem:[#allocation2 + $0x50] sm:$0xfc] }
 0x139   : > { %v712_v46 = vadd.f32 %v652_v42, %v3233_v19  ;;  %v831_v59 = vsel %vm795_vm10, %v826_v14, %v830_v60  ;;  %v888_v9 = vadd.f32 %v829_v17, %v713_v4  ;;  %1581 = vrot.lane.b32.xlu1 %v3364_v8, %s2757_s7  ;;  %v964_v21 = vsel %vm934_vm11, %v4497_v58, %v963_v49 }
 0x13a   : > { %v886_v23 = vadd.f32 %v825_v7, %v711_v24  ;;  %v889_v0 = vadd.f32 %v831_v59, %v714_v3  ;;  %v4498_v27 = vrot.slane %v3242_v43, 3  ;;  %v968_v60 = vsel %vm934_vm11, %v963_v49, %v967_v32  ;;  %v522_v24 = vld [vmem:[#allocation2 + $0xd0] sm:$0xff]  ;;  %v558_v7 = vld [vmem:[#allocation2 + $0xe0] sm:$0x1] }
 0x13b   : > { %v887_v39 = vadd.f32 %v827_v53, %v712_v46  ;;  %v970_v14 = vsel %vm934_vm11, %v965_v37, %v969_v28  ;;  %v1027_v48 = vadd.f32 %v968_v60, %v888_v9  ;;  %v523_v46 = vld [vmem:[#allocation2 + $0xd8] sm:$0xff]  ;;  %v4499_v4 = vrot.slane %v3233_v19, 4  ;;  %v559_v19 = vld [vmem:[#allocation2 + $0xe8] sm:$0x1] }
 0x13c   : > { %v966_v61 = vsel %vm934_vm11, %v4498_v27, %v965_v37  ;;  %v1025_v16 = vadd.f32 %v964_v21, %v886_v23  ;;  %v1028_v1 = vadd.f32 %v970_v14, %v889_v0  ;;  %v1125_v3 = vsel %vm1091_vm12, %v1120_v15, %v1124_v30  ;;  %v519_v53 = vld [vmem:[#allocation2 + $0xb8] sm:$0xff] }
 0x13d   : > { %v1026_v42 = vadd.f32 %v966_v61, %v887_v39  ;;  %v1123_v54 = vsel %vm1091_vm12, %v4499_v4, %v1122_v57  ;;  %v1127_v43 = vsel %vm1091_vm12, %v1122_v57, %v1126_v11  ;;  %v3381_v2 = vmul.f32 0.02153928, %v518_v18 }
 0x13e   : > { %v1182_v32 = vadd.f32 %v1121_v5, %v1025_v16  ;;  %v1184_v37 = vadd.f32 %v1125_v3, %v1027_v48  ;;  %v1185_v28 = vadd.f32 %v1127_v43, %v1028_v1  ;;  %v3383_v17 = vmul.f32 0.02153928, %v522_v24 }
 0x13f   : > { %v1183_v49 = vadd.f32 %v1123_v54, %v1026_v42  ;;  %v3385_v59 = vmul.f32 0.02153928, %v523_v46  ;;  %v3387_v23 = vmul.f32 0.09653235, %v518_v18  ;;  %v3389_v11 = vmul.f32 0.09653235, %v519_v53 }
 0x140   : > { %v1238_v39 = vrot.slane %v1182_v32, 6  ;;  %v1242_v30 = vrot.slane %v1184_v37, 6  ;;  %v1244_v15 = vrot.slane %v1185_v28, 6  ;;  %v3391_v57 = vmul.f32 0.09653235, %v522_v24 }
 0x141   : > { %v1240_v9 = vrot.slane %v1183_v49, 6  ;;  %v3393_v5 = vmul.f32 0.09653235, %v523_v46  ;;  %v4500_v0 = vrot.slane %v3322_v38, 6  ;;  %v4501_v21 = vrot.slane %v3324_v62, 6 }
 0x142   : > { %v1243_v61 = vsel %vm397_vm2, %v1238_v39, %v1242_v30  ;;  %1308 = vst.msk [vmem:[#allocation2 + $0x90] sm:$0x3] %vm476_vm5, %v1242_v30  ;;  %v588_v38 = vmul.f32 0.09653235, %v558_v7  ;;  %v589_v62 = vmul.f32 0.09653235, %v559_v19 }
 0x143   : > { %v1239_v58 = vsel %vm397_vm2, %v4500_v0, %v1238_v39  ;;  %v1241_v27 = vsel %vm397_vm2, %v4501_v21, %v1240_v9  ;;  %v1245_v60 = vsel %vm397_vm2, %v1240_v9, %v1244_v15  ;;  %1309 = vst.msk [vmem:[#allocation2 + $0x98] sm:$0x3] %vm478_vm6, %v1244_v15  ;;  %v658_v14 = vrot.slane %v3387_v23, 1  ;;  %v1045_v30 = vld [vmem:[#allocation2 + $0xa0] sm:$0xf0] }
 0x144   : > { %1304 = vst.msk [vmem:[#allocation2 + $0x70] sm:$0xff] %vm468_vm7, %v1239_v58  ;;  %1306 = vst.msk [vmem:[#allocation2 + $0x80] sm:$0xff] %vm468_vm7, %v1243_v61  ;;  %v661_v16 = vrot.slane %v3389_v11, 1  ;;  %v667_v42 = vrot.slane %v3391_v57, 1  ;;  %v669_v48 = vrot.slane %v3393_v5, 1  ;;  %v4502_v54 = vrot.slane %v3075_v40, 1 }
 0x145   : > { %1305 = vst.msk [vmem:[#allocation2 + $0x78] sm:$0xff] %vm470_vm8, %v1241_v27  ;;  %1307 = vst.msk [vmem:[#allocation2 + $0x88] sm:$0xff] %vm470_vm8, %v1245_v60  ;;  %v3413_v1 = vmul.f32 0.15915494, %v518_v18  ;;  %v3415_v4 = vmul.f32 0.15915494, %v519_v53 }
 0x146   : > { %v659_v3 = vsel %vm620_vm9, %v4502_v54, %v658_v14  ;;  %v4503_v43 = vrot.slane %v3077_v41, 1  ;;  %v671_v32 = vrot.slane %v588_v38, 1  ;;  %v673_v49 = vrot.slane %v589_v62, 1  ;;  %v1046_v38 = vld [vmem:[#allocation2 + $0xa8] sm:$0xf0] }
 0x147   : > { %v715_v37 = vadd.f32 %v659_v3, %v3069_v34  ;;  %v3429_v28 = vmul.f32 0.15915494, %v522_v24  ;;  %v3431_v19 = vmul.f32 0.15915494, %v523_v46  ;;  %v833_v39 = vrot.slane %v3413_v1, 2 }
 0x148   : > { %v662_v7 = vsel %vm620_vm9, %v4503_v43, %v661_v16  ;;  %v672_v40 = vsel %vm620_vm9, %v667_v42, %v671_v32  ;;  %v674_v41 = vsel %vm620_vm9, %v669_v48, %v673_v49  ;;  %v836_v9 = vrot.slane %v3415_v4, 2  ;;  %v1047_v62 = vld [vmem:[#allocation2 + $0xe0] sm:$0xf]  ;;  %v1048_v49 = vld [vmem:[#allocation2 + $0xe8] sm:$0xf] }
 0x149   : > { %v716_v18 = vadd.f32 %v662_v7, %v3081_v50  ;;  %v721_v34 = vadd.f32 %v672_v40, %v3383_v17  ;;  %v722_v50 = vadd.f32 %v674_v41, %v3385_v59  ;;  %v842_v24 = vrot.slane %v3429_v28, 2  ;;  %v3471_v32 = vld [vmem:[#allocation2 + $0x90] sm:$0x3] }
 0x14a   : > { %v844_v46 = vrot.slane %v3431_v19, 2  ;;  %v4504_v15 = vrot.slane %v3079_v45, 2  ;;  %v4505_v58 = vrot.slane %v3083_v51, 2  ;;  %v972_v27 = vrot.slane %v3387_v23, 3  ;;  %v3457_v60 = vld [vmem:[#allocation2 + $0x98] sm:$0x3]  ;;  %1597 = vrot.lane.b32.xlu1 %v3471_v32, %s2757_s7 }
 0x14b   : > { %v975_v61 = vrot.slane %v3389_v11, 3  ;;  %v4506_v54 = vrot.slane %v3164_v63, 2  ;;  %v4507_v3 = vrot.slane %v3166_v25, 2  ;;  %1599 = vrot.lane.b32.xlu0 %v3457_v60, %s2757_s7  ;;  %v3473_v40 = vmul.f32 0.02153928, %v519_v53 }
 0x14c   : > { %v834_v0 = vsel %vm795_vm10, %v4504_v15, %v833_v39  ;;  %v837_v21 = vsel %vm795_vm10, %v4505_v58, %v836_v9  ;;  %v4508_v25 = vrot.slane %v3088_v55, 3  ;;  %v4450_v53 = vrot.slane %v3391_v57, 3 }
 0x14d   : > { %v847_v45 = vsel %vm795_vm10, %v842_v24, %v4506_v54  ;;  %v849_v51 = vsel %vm795_vm10, %v844_v46, %v4507_v3  ;;  %v890_v43 = vadd.f32 %v834_v0, %v715_v37  ;;  %v891_v7 = vadd.f32 %v837_v21, %v716_v18 }
 0x14e   : > { %v896_v63 = vadd.f32 %v847_v45, %v721_v34  ;;  %v897_v41 = vadd.f32 %v849_v51, %v722_v50  ;;  %v973_v15 = vsel %vm934_vm11, %v4508_v25, %v972_v27  ;;  %v4509_v37 = vrot.slane %v3090_v56, 3 }
 0x14f   : > { %v4447_v34 = vrot.slane %v3393_v5, 3  ;;  %v1029_v50 = vadd.f32 %v973_v15, %v890_v43  ;;  %v1057_v58 = vmul.f32 0.02153928, %v1045_v30  ;;  %v1058_v21 = vmul.f32 0.02153928, %v1046_v38 }
 0x150   : > { %v976_v18 = vsel %vm934_vm11, %v4509_v37, %v975_v61  ;;  %v1059_v55 = vmul.f32 0.02153928, %v1047_v62  ;;  %v4510_v54 = vrot.slane %v3178_v12, 3  ;;  %v4511_v3 = vrot.slane %v3180_v52, 3  ;;  %v520_v62 = vld [vmem:[#allocation2 + $0xc0] sm:$0xff]  ;;  %v521_v52 = vld [vmem:[#allocation2 + $0xc8] sm:$0xff] }
 0x151   : > { %v1030_v0 = vadd.f32 %v976_v18, %v891_v7  ;;  %v1060_v51 = vmul.f32 0.02153928, %v1048_v49  ;;  %v4448_v25 = vrot.slane %v3381_v2, 4  ;;  %v1128_v30 = vrot.slane %v1057_v58, 4 }
 0x152   : > { %v986_v45 = vsel %vm934_vm11, %v4450_v53, %v4510_v54  ;;  %v988_v56 = vsel %vm934_vm11, %v4447_v34, %v4511_v3  ;;  %v1131_v38 = vrot.slane %v1058_v21, 4  ;;  %v4449_v12 = vrot.slane %v3473_v40, 4 }
 0x153   : > { %v1035_v43 = vadd.f32 %v986_v45, %v896_v63  ;;  %v1036_v7 = vadd.f32 %v988_v56, %v897_v41  ;;  %v1138_v15 = vrot.slane %v3383_v17, 4  ;;  %v1140_v37 = vrot.slane %v3385_v59, 4 }
 0x154   : > { %v1142_v18 = vrot.slane %v1059_v55, 4  ;;  %v1130_v54 = vsel %vm1091_vm12, %v1128_v30, %v4448_v25  ;;  %v1144_v49 = vrot.slane %v1060_v51, 4  ;;  %v544_v3 = vmul.f32 0.02153928, %v520_v62 }
 0x155   : > { %v545_v34 = vmul.f32 0.02153928, %v521_v52  ;;  %v1133_v63 = vsel %vm1091_vm12, %v1131_v38, %v4449_v12  ;;  %v3510_v58 = vadd.f32 %v1130_v54, %v1029_v50  ;;  %v584_v17 = vmul.f32 0.09653235, %v520_v62 }
 0x156   : > { %v1143_v41 = vsel %vm1091_vm12, %v1138_v15, %v1142_v18  ;;  %v1145_v21 = vsel %vm1091_vm12, %v1140_v37, %v1144_v49  ;;  %v3515_v55 = vadd.f32 %v1133_v63, %v1030_v0  ;;  %v585_v56 = vmul.f32 0.09653235, %v521_v52 }
 0x157   : > { %v3517_v45 = vadd.f32 %v1143_v41, %v1035_v43  ;;  %v3519_v51 = vadd.f32 %v1145_v21, %v1036_v7  ;;  %v1246_v30 = vrot.slane %v3510_v58, 6  ;;  %v663_v25 = vrot.slane %v584_v17, 1 }
 0x158   : > { %v759_v38 = vmul.f32 0.15915494, %v520_v62  ;;  %v1247_v18 = vrot.slane %v3515_v55, 6  ;;  %v665_v54 = vrot.slane %v585_v56, 1  ;;  %v760_v12 = vmul.f32 0.15915494, %v521_v52 }
 0x159   : > { %v1256_v50 = vrot.slane %v3517_v45, 6  ;;  %v1258_v53 = vrot.slane %v3519_v51, 6  ;;  %v664_v0 = vsel %vm620_vm9, %v658_v14, %v663_v25  ;;  %v668_v43 = vsel %vm620_vm9, %v663_v25, %v667_v42  ;;  %1310 = vst.msk [vmem:[#allocation2 + $0xa0] sm:$0xfc] %vm464_vm3, %v1246_v30  ;;  %v3619_v55 = vld [vmem:[#allocation2 + $0x28] sm:$0xff] }
 0x15a   : > { %v838_v7 = vrot.slane %v759_v38, 2  ;;  %v666_v62 = vsel %vm620_vm9, %v661_v16, %v665_v54  ;;  %v670_v52 = vsel %vm620_vm9, %v665_v54, %v669_v48  ;;  %v717_v49 = vadd.f32 %v664_v0, %v3381_v2  ;;  %1311 = vst.msk [vmem:[#allocation2 + $0xa8] sm:$0xfc] %vm466_vm4, %v1247_v18 }
 0x15b   : > { %v719_v63 = vadd.f32 %v668_v43, %v544_v3  ;;  %1318 = vst.msk [vmem:[#allocation2 + $0xe0] sm:$0x3] %vm476_vm5, %v1256_v50  ;;  %v718_v14 = vadd.f32 %v666_v62, %v3473_v40  ;;  %v720_v42 = vadd.f32 %v670_v52, %v545_v34  ;;  %v840_v25 = vrot.slane %v760_v12, 2 }
 0x15c   : > { %v839_v16 = vsel %vm795_vm10, %v833_v39, %v838_v7  ;;  %1319 = vst.msk [vmem:[#allocation2 + $0xe8] sm:$0x3] %vm478_vm6, %v1258_v53  ;;  %v843_v48 = vsel %vm795_vm10, %v838_v7, %v842_v24  ;;  %v977_v58 = vrot.slane %v584_v17, 3  ;;  %v979_v21 = vrot.slane %v585_v56, 3 }
 0x15d   : > { %v892_v41 = vadd.f32 %v839_v16, %v717_v49  ;;  %v841_v45 = vsel %vm795_vm10, %v836_v9, %v840_v25  ;;  %v845_v1 = vsel %vm795_vm10, %v840_v25, %v844_v46  ;;  %v894_v51 = vadd.f32 %v843_v48, %v719_v63 }
 0x15e   : > { %v1134_v39 = vrot.slane %v544_v3, 4  ;;  %v893_v12 = vadd.f32 %v841_v45, %v718_v14  ;;  %v895_v38 = vadd.f32 %v845_v1, %v720_v42  ;;  %v978_v28 = vsel %vm934_vm11, %v972_v27, %v977_v58  ;;  %v3635_v45 = vld [vmem:[#allocation2 + $0x68] sm:$0xff]  ;;  %v3641_v1 = vld [vmem:[#allocation2 + $0x70] sm:$0xff] }
 0x15f   : > { %v980_v24 = vsel %vm934_vm11, %v975_v61, %v979_v21  ;;  %v4512_v4 = vrot.slane %v3391_v57, 3  ;;  %v4513_v19 = vrot.slane %v3393_v5, 3  ;;  %v1031_v17 = vadd.f32 %v978_v28, %v892_v41  ;;  %v3611_v41 = vld [vmem:[#allocation2 + $0x18] sm:$0xff] }
 0x160   : > { %v4514_v3 = vrot.slane %v3381_v2, 4  ;;  %v1032_v23 = vadd.f32 %v980_v24, %v893_v12  ;;  %v1136_v0 = vrot.slane %v545_v34, 4  ;;  %v3572_v11 = vld [vmem:[#allocation2 + $0xa0] sm:$0xfc]  ;;  %v1139_v61 = vsel %vm1091_vm12, %v1134_v39, %v1138_v15  ;;  %v3651_v12 = vld [vmem:[#allocation2 + $0x88] sm:$0xff] }
 0x161   : > { %v982_v9 = vsel %vm934_vm11, %v977_v58, %v4512_v4  ;;  %v984_v46 = vsel %vm934_vm11, %v979_v21, %v4513_v19  ;;  %v3575_v43 = vld [vmem:[#allocation2 + $0xa8] sm:$0xfc]  ;;  %1601 = vrot.lane.b32.xlu1 %v3572_v11, %s2757_s7  ;;  %v4515_v5 = vrot.slane %v3473_v40, 4  ;;  %v3627_v58 = vld [vmem:[#allocation2 + $0x38] sm:$0xff]  ;;  %v3633_v21 = vld [vmem:[#allocation2 + $0x60] sm:$0xff] }
 0x162   : > { %v1135_v56 = vsel %vm1091_vm12, %v4514_v3, %v1134_v39  ;;  %v1033_v54 = vadd.f32 %v982_v9, %v894_v51  ;;  %v1034_v27 = vadd.f32 %v984_v46, %v895_v38  ;;  %v1141_v7 = vsel %vm1091_vm12, %v1136_v0, %v1140_v37  ;;  %1603 = vrot.lane.b32.xlu0 %v3575_v43, %s2757_s7  ;;  %v3587_v63 = vld [vmem:[#allocation2 + $0xe0] sm:$0x3]  ;;  %v3643_v51 = vld [vmem:[#allocation2 + $0x78] sm:$0xff] }
 0x163   : > { %v1188_v57 = vadd.f32 %v1135_v56, %v1031_v17  ;;  %v1137_v2 = vsel %vm1091_vm12, %v4515_v5, %v1136_v0  ;;  %v3590_v16 = vld [vmem:[#allocation2 + $0xe8] sm:$0x3]  ;;  %v3649_v39 = vld [vmem:[#allocation2 + $0x80] sm:$0xff]  ;;  %v1365_v46 = vmul.f32 0.60653067, %v3278_v13 }
 0x164   : > { %v1190_v62 = vadd.f32 %v1139_v61, %v1033_v54  ;;  %v1189_v34 = vadd.f32 %v1137_v2, %v1032_v23  ;;  %v1191_v15 = vadd.f32 %v1141_v7, %v1034_v27  ;;  %4516 = vst [vmem:[#allocation25_spill] sm:$0xff] %v3590_v16  ;;  %v1366_v17 = vmul.f32 0.60653067, %v3272_v10 }
 0x165   : > { %v1248_v52 = vrot.slane %v1188_v57, 6  ;;  %1617 = vrot.lane.b32.xlu1 %v3587_v63, %s2757_s7  ;;  %v1373_v3 = vmul.f32 0.60653067, %v3304_v6  ;;  %v1374_v56 = vmul.f32 0.60653067, %v3300_v20 }
 0x166   : > { %v1252_v49 = vrot.slane %v1190_v62, 6  ;;  %v1250_v42 = vrot.slane %v1189_v34, 6  ;;  %v1254_v40 = vrot.slane %v1191_v15, 6  ;;  %1619 = vrot.lane.b32.xlu0 %v3590_v16, %s2757_s7  ;;  %v1375_v23 = vmul.f32 0.60653067, %v3364_v8 }
 0x167   : > { %v1249_v14 = vsel %vm397_vm2, %v1246_v30, %v1248_v52  ;;  %v1376_v54 = vmul.f32 0.60653067, %v3352_v36  ;;  %v3694_v27 = vmul.f32 0.60653067, %v3471_v32  ;;  %v3697_v0 = vmul.f32 0.60653067, %v3457_v60 }
 0x168   : > { %v1253_v59 = vsel %vm397_vm2, %v1248_v52, %v1252_v49  ;;  %v1257_v37 = vsel %vm397_vm2, %v1252_v49, %v1256_v50  ;;  %1312 = vst.msk [vmem:[#allocation2 + $0xb0] sm:$0xff] %vm468_vm7, %v1249_v14  ;;  %v1251_v30 = vsel %vm397_vm2, %v1247_v18, %v1250_v42  ;;  %v1255_v25 = vsel %vm397_vm2, %v1250_v42, %v1254_v40  ;;  %v3609_v50 = vld [vmem:[#allocation2 + $0x10] sm:$0xff] }
 0x169   : > { %v1259_v48 = vsel %vm397_vm2, %v1254_v40, %v1258_v53  ;;  %1314 = vst.msk [vmem:[#allocation2 + $0xc0] sm:$0xff] %vm468_vm7, %v1253_v59  ;;  %1316 = vst.msk [vmem:[#allocation2 + $0xd0] sm:$0xff] %vm468_vm7, %v1257_v37  ;;  %1565 = vrot.lane.b32.xlu1 %v3609_v50, %s2757_s7  ;;  %v3617_v53 = vld [vmem:[#allocation2 + $0x20] sm:$0xff]  ;;  %v3625_v18 = vld [vmem:[#allocation2 + $0x30] sm:$0xff]  ;;  %v1385_v20 = vmul.f32 0.60653067, %v3572_v11 }
 0x16a   : > { %1313 = vst.msk [vmem:[#allocation2 + $0xb8] sm:$0xff] %vm470_vm8, %v1251_v30  ;;  %1315 = vst.msk [vmem:[#allocation2 + $0xc8] sm:$0xff] %vm470_vm8, %v1255_v25  ;;  %1567 = vrot.lane.b32.xlu0 %v3611_v41, %s2757_s7  ;;  %v1386_v61 = vmul.f32 0.60653067, %v3575_v43  ;;  %v3708_v57 = vmul.f32 0.60653067, %v3587_v63 }
 0x16b   : > { %1317 = vst.msk [vmem:[#allocation2 + $0xd8] sm:$0xff] %vm470_vm8, %v1259_v48  ;;  %v3711_v5 = vmul.f32 0.60653067, %v3590_v16  ;;  %v1367_v2 = vmul.f32 0.60653067, %v3609_v50 }
 0x16c   : > { %v1368_v7 = vmul.f32 0.60653067, %v3611_v41  ;;  %v1369_v62 = vmul.f32 0.60653067, %v3617_v53  ;;  %v1370_v34 = vmul.f32 0.60653067, %v3619_v55 }
 0x16d   : > { %1569 = vrot.lane.b32.xlu1 %v3617_v53, %s2757_s7  ;;  %v1371_v15 = vmul.f32 0.60653067, %v3625_v18  ;;  %v1372_v49 = vmul.f32 0.60653067, %v3627_v58  ;;  %v1377_v42 = vmul.f32 0.60653067, %v3633_v21 }
 0x16e   : > { %1571 = vrot.lane.b32.xlu0 %v3619_v55, %s2757_s7  ;;  %v1378_v40 = vmul.f32 0.60653067, %v3635_v45  ;;  %v1379_v30 = vmul.f32 0.60653067, %v3641_v1  ;;  %v1380_v25 = vmul.f32 0.60653067, %v3643_v51 }
 0x16f   : > { %v3657_v38 = vld [vmem:[#allocation2 + $0xb0] sm:$0xff]  ;;  %v1381_v48 = vmul.f32 0.60653067, %v3649_v39 }
 0x170   : > { %v3665_v24 = vld [vmem:[#allocation2 + $0xc0] sm:$0xff]  ;;  %v3673_v9 = vld [vmem:[#allocation2 + $0xd0] sm:$0xff] }
 0x171   : > { %1573 = vrot.lane.b32.xlu1 %v3625_v18, %s2757_s7  ;;  %v3659_v28 = vld [vmem:[#allocation2 + $0xb8] sm:$0xff]  ;;  %v3667_v4 = vld [vmem:[#allocation2 + $0xc8] sm:$0xff]  ;;  %v1391_v44 = vmul.f32 0.60653067, %v3673_v9 }
 0x172   : > { %1575 = vrot.lane.b32.xlu0 %v3627_v58, %s2757_s7  ;;  %v3675_v19 = vld [vmem:[#allocation2 + $0xd8] sm:$0xff]  ;;  %v1390_v35 = vmul.f32 0.60653067, %v3667_v4 }
 0x173   : > { %v1392_v26 = vmul.f32 0.60653067, %v3675_v19 }
 0x175   : > { %1585 = vrot.lane.b32.xlu1 %v3633_v21, %s2757_s7 }
 0x176   : > { %1587 = vrot.lane.b32.xlu0 %v3635_v45, %s2757_s7 }
 0x179   : > { %1589 = vrot.lane.b32.xlu1 %v3641_v1, %s2757_s7 }
 0x17a   : > { %1591 = vrot.lane.b32.xlu0 %v3643_v51, %s2757_s7 }
 0x17d   : > { %1593 = vrot.lane.b32.xlu1 %v3649_v39, %s2757_s7 }
 0x17e   : > { %1595 = vrot.lane.b32.xlu0 %v3651_v12, %s2757_s7 }
 0x181   : > { %1605 = vrot.lane.b32.xlu1 %v3657_v38, %s2757_s7 }
 0x182   : > { %1607 = vrot.lane.b32.xlu0 %v3659_v28, %s2757_s7 }
 0x185   : > { %1609 = vrot.lane.b32.xlu1 %v3665_v24, %s2757_s7 }
 0x186   : > { %1611 = vrot.lane.b32.xlu0 %v3667_v4, %s2757_s7 }
 0x189   : > { %1613 = vrot.lane.b32.xlu1 %v3673_v9, %s2757_s7 }
 0x18a   : > { %1615 = vrot.lane.b32.xlu0 %v3675_v19, %s2757_s7 }
 0x18d   : > { %1425 = vrot.lane.b32.xlu1 %v1365_v46, %s2758_s8 }
 0x18e   : > { %1427 = vrot.lane.b32.xlu0 %v1366_v17, %s2758_s8 }
 0x191   : > { %1441 = vrot.lane.b32.xlu1 %v1373_v3, %s2758_s8 }
 0x192   : > { %1443 = vrot.lane.b32.xlu0 %v1374_v56, %s2758_s8 }
 0x195   : > { %1445 = vrot.lane.b32.xlu1 %v1375_v23, %s2758_s8  ;;  %v3737_v14 = vpop.permute.xlu0 %1563 }
 0x196   : > { %1447 = vrot.lane.b32.xlu0 %v1376_v54, %s2758_s8  ;;  %v3734_v52 = vpop.permute.xlu1 %1561 }
 0x199   : > { %1461 = vrot.lane.b32.xlu1 %v3694_v27, %s2758_s8  ;;  %v3747_v37 = vpop.permute.xlu0 %1579 }
 0x19a   : > { %1463 = vrot.lane.b32.xlu0 %v3697_v0, %s2758_s8  ;;  %v3744_v59 = vpop.permute.xlu1 %1577 }
 0x19d   : > { %1465 = vrot.lane.b32.xlu1 %v1385_v20, %s2758_s8 }
 0x19e   : > { %1467 = vrot.lane.b32.xlu0 %v1386_v61, %s2758_s8 }
 0x1a1   : > { %1481 = vrot.lane.b32.xlu1 %v3708_v57, %s2758_s8 }
 0x1a2   : > { %1483 = vrot.lane.b32.xlu0 %v3711_v5, %s2758_s8 }
 0x1a5   : > { %1667 = vrot.lane.b32.xlu1 %v1365_v46, %s2759_s10 }
 0x1a6   : > { %1669 = vrot.lane.b32.xlu0 %v1366_v17, %s2759_s10  ;;  %v3757_v17 = vmul.f32 0.60653067, %v3651_v12 }
 0x1a9   : > { %1683 = vrot.lane.b32.xlu1 %v1373_v3, %s2759_s10 }
 0x1aa   : > { %1685 = vrot.lane.b32.xlu0 %v1374_v56, %s2759_s10  ;;  %v3759_v3 = vpop.permute.xlu0 %1583  ;;  %v1387_v56 = vmul.f32 0.60653067, %v3657_v38 }
 0x1ab   : > { %v3754_v46 = vpop.permute.xlu1 %1581 }
 0x1ad   : > { %1687 = vrot.lane.b32.xlu1 %v1375_v23, %s2759_s10  ;;  %v1388_v23 = vmul.f32 0.60653067, %v3659_v28 }
 0x1ae   : > { %1689 = vrot.lane.b32.xlu0 %v1376_v54, %s2759_s10 }
 0x1b1   : > { %1709 = vrot.lane.b32.xlu1 %v1386_v61, %s2759_s10  ;;  %v1389_v61 = vmul.f32 0.60653067, %v3665_v24 }
 0x1b2   : > { %1707 = vrot.lane.b32.xlu0 %v1385_v20, %s2759_s10 }
 0x1b5   : > { %1429 = vrot.lane.b32.xlu1 %v1367_v2, %s2758_s8 }
 0x1b6   : > { %1431 = vrot.lane.b32.xlu0 %v1368_v7, %s2758_s8 }
 0x1b9   : > { %1433 = vrot.lane.b32.xlu1 %v1369_v62, %s2758_s8 }
 0x1ba   : > { %1435 = vrot.lane.b32.xlu0 %v1370_v34, %s2758_s8 }
 0x1bc   : > { %v3767_v54 = vpop.permute.xlu1 %1597 }
 0x1bd   : > { %1437 = vrot.lane.b32.xlu1 %v1371_v15, %s2758_s8  ;;  %4517 = vst [vmem:[#allocation26_spill] sm:$0xff] %v3767_v54  ;;  %v3770_v20 = vpop.permute.xlu0 %1599 }
 0x1be   : > { %1439 = vrot.lane.b32.xlu0 %v1372_v49, %s2758_s8  ;;  %4518 = vst [vmem:[#allocation27_spill] sm:$0xff] %v3770_v20 }
 0x1c1   : > { %1449 = vrot.lane.b32.xlu1 %v1377_v42, %s2758_s8 }
 0x1c2   : > { %1451 = vrot.lane.b32.xlu0 %v1378_v40, %s2758_s8 }
 0x1c5   : > { %1453 = vrot.lane.b32.xlu1 %v1379_v30, %s2758_s8 }
 0x1c6   : > { %1455 = vrot.lane.b32.xlu0 %v1380_v25, %s2758_s8 }
 0x1c9   : > { %1457 = vrot.lane.b32.xlu1 %v1381_v48, %s2758_s8 }
 0x1ca   : > { %1459 = vrot.lane.b32.xlu0 %v3757_v17, %s2758_s8 }
 0x1cd   : > { %1469 = vrot.lane.b32.xlu1 %v1387_v56, %s2758_s8 }
 0x1ce   : > { %1471 = vrot.lane.b32.xlu0 %v1388_v23, %s2758_s8 }
 0x1d1   : > { %1473 = vrot.lane.b32.xlu1 %v1389_v61, %s2758_s8 }
 0x1d2   : > { %1475 = vrot.lane.b32.xlu0 %v1390_v35, %s2758_s8 }
 0x1d3   : > { %v3776_v47 = vpop.permute.xlu1 %1601 }
 0x1d4   : > { %v3779_v33 = vpop.permute.xlu0 %1603 }
 0x1d5   : > { %1477 = vrot.lane.b32.xlu1 %v1391_v44, %s2758_s8 }
 0x1d6   : > { %1479 = vrot.lane.b32.xlu0 %v1392_v26, %s2758_s8  ;;  %s2628_s8 = sshll.u32 %s2762_s9, 4  ;;  %s2629_s8 = int_to_ptr.vmem [resolvable:$false] %s2628_s8 }
 0x1d7   : > { %v3784_v31 = vpop.permute.xlu1 %1617  ;;  %p2631_p10 = scmp.lt.s32.totalorder %s4275_s25, %s2629_s8 }
 0x1d8   : > { %4519 = vst [vmem:[#allocation28_spill] sm:$0xff] %v3784_v31  ;;  %v3786_v29 = vpop.permute.xlu0 %1619 }
 0x1d9   : > { %4520 = vst [vmem:[#allocation29_spill] sm:$0xff] %v3786_v29  ;;  %1671 = vrot.lane.b32.xlu1 %v1367_v2, %s2759_s10  ;;  %v3837_v29 = vmul.f32 0.13533528, %v3364_v8  ;;  %v1783_v8 = vmul.f32 0.13533528, %v3575_v43 }
 0x1da   : > { %1673 = vrot.lane.b32.xlu0 %v1368_v7, %s2759_s10 }
 0x1db   : > { %v3790_v22 = vpop.permute.xlu1 %1565 }
 0x1dc   : > { %v3792_v54 = vpop.permute.xlu0 %1567 }
 0x1dd   : > { %1675 = vrot.lane.b32.xlu1 %v1369_v62, %s2759_s10 }
 0x1de   : > { %1677 = vrot.lane.b32.xlu0 %v1370_v34, %s2759_s10 }
 0x1df   : > { %v3796_v20 = vpop.permute.xlu1 %1569 }
 0x1e0   : > { %v3798_v16 = vpop.permute.xlu0 %1571 }
 0x1e1   : > { %1679 = vrot.lane.b32.xlu1 %v1371_v15, %s2759_s10 }
 0x1e2   : > { %1681 = vrot.lane.b32.xlu0 %v1372_v49, %s2759_s10 }
 0x1e3   : > { %v3802_v31 = vpop.permute.xlu1 %1573 }
 0x1e4   : > { %v3804_v2 = vpop.permute.xlu0 %1575 }
 0x1e5   : > { %1691 = vrot.lane.b32.xlu1 %v1377_v42, %s2759_s10 }
 0x1e6   : > { %1693 = vrot.lane.b32.xlu0 %v1378_v40, %s2759_s10 }
 0x1e7   : > { %v3808_v7 = vpop.permute.xlu1 %1585 }
 0x1e8   : > { %v3810_v62 = vpop.permute.xlu0 %1587 }
 0x1e9   : > { %1695 = vrot.lane.b32.xlu1 %v1379_v30, %s2759_s10  ;;  %v1335_v30 = vmul.f32 0.13533528, %v3278_v13  ;;  %v1778_v13 = vmul.f32 0.13533528, %v3352_v36 }
 0x1ea   : > { %1697 = vrot.lane.b32.xlu0 %v1380_v25, %s2759_s10 }
 0x1eb   : > { %v3814_v34 = vpop.permute.xlu1 %1589 }
 0x1ec   : > { %v3816_v15 = vpop.permute.xlu0 %1591 }
 0x1ed   : > { %1699 = vrot.lane.b32.xlu1 %v1381_v48, %s2759_s10  ;;  %v1773_v48 = vmul.f32 0.13533528, %v3272_v10 }
 0x1ee   : > { %1711 = vrot.lane.b32.xlu0 %v1387_v56, %s2759_s10 }
 0x1ef   : > { %v3820_v49 = vpop.permute.xlu1 %1593 }
 0x1f0   : > { %4521 = vst [vmem:[#allocation30_spill] sm:$0xff] %v3820_v49  ;;  %v3822_v42 = vpop.permute.xlu0 %1595 }
 0x1f1   : > { %4522 = vst [vmem:[#allocation31_spill] sm:$0xff] %v3822_v42  ;;  %1713 = vrot.lane.b32.xlu1 %v1388_v23, %s2759_s10 }
 0x1f2   : > { %1715 = vrot.lane.b32.xlu0 %v1389_v61, %s2759_s10  ;;  %v3848_v61 = vmul.f32 0.13533528, %v3572_v11  ;;  %v3862_v11 = vmul.f32 0.13533528, %v3609_v50  ;;  %v3880_v50 = vmul.f32 0.13533528, %v3633_v21 }
 0x1f3   : > { %v3826_v40 = vpop.permute.xlu1 %1605  ;;  %v1780_v21 = vmul.f32 0.13533528, %v3643_v51  ;;  %v1622_v51 = vsel %vm1621_vm14, %v3734_v52, %v3737_v14  ;;  %v3921_v52 = vmul.f32 0.13533528, %v3665_v24 }
 0x1f4   : > { %v3829_v25 = vpop.permute.xlu0 %1607 }
 0x1f5   : > { %1717 = vrot.lane.b32.xlu1 %v1390_v35, %s2759_s10 }
 0x1f6   : > { %1818 = vrot.lane.b32.xlu0 %v1335_v30, %s2760_s11 }
 0x1f7   : > { %v3834_v56 = vpop.permute.xlu1 %1609 }
 0x1f8   : > { %4523 = vst [vmem:[#allocation32_spill] sm:$0xff] %v3834_v56  ;;  %v3839_v23 = vpop.permute.xlu0 %1611 }
 0x1f9   : > { %1820 = vrot.lane.b32.xlu1 %v1773_v48, %s2760_s11 }
 0x1fa   : > { %1838 = vrot.lane.b32.xlu0 %v3837_v29, %s2760_s11 }
 0x1fb   : > { %v3845_v35 = vpop.permute.xlu1 %1613 }
 0x1fc   : > { %4524 = vst [vmem:[#allocation33_spill] sm:$0xff] %v3845_v35  ;;  %v3850_v10 = vpop.permute.xlu0 %1615 }
 0x1fd   : > { %4525 = vst [vmem:[#allocation34_spill] sm:$0xff] %v3850_v10  ;;  %1840 = vrot.lane.b32.xlu1 %v1778_v13, %s2760_s11  ;;  %v1774_v10 = vmul.f32 0.13533528, %v3611_v41 }
 0x1fe   : > { %1858 = vrot.lane.b32.xlu0 %v3848_v61, %s2760_s11 }
 0x1ff   : > { %v1426_v48 = vpop.permute.xlu1 %1425 }
 0x200   : > { %v1428_v49 = vpop.permute.xlu0 %1427 }
 0x201   : > { %1860 = vrot.lane.b32.xlu1 %v1783_v8, %s2760_s11  ;;  %v1486_v42 = vsel %vm1485_vm13, %v1426_v48, %v1428_v49  ;;  %v3899_v48 = vmul.f32 0.13533528, %v3304_v6 }
 0x202   : > { %1701 = vrot.lane.b32.xlu0 %v3757_v17, %s2759_s10  ;;  %v3869_v17 = vmul.f32 0.13533528, %v3617_v53 }
 0x203   : > { %v1442_v36 = vpop.permute.xlu1 %1441 }
 0x204   : > { %v1444_v35 = vpop.permute.xlu0 %1443 }
 0x205   : > { %1719 = vrot.lane.b32.xlu1 %v1391_v44, %s2759_s10  ;;  %v1775_v44 = vmul.f32 0.13533528, %v3619_v55  ;;  %v3888_v55 = vmul.f32 0.13533528, %v3641_v1  ;;  %v1490_v56 = vsel %vm1485_vm13, %v1442_v36, %v1444_v35 }
 0x206   : > { %1721 = vrot.lane.b32.xlu0 %v1392_v26, %s2759_s10  ;;  %v1520_v35 = vadd.f32 %v1490_v56, %v3899_v48  ;;  %v1785_v56 = vmul.f32 0.13533528, %v3667_v4 }
 0x207   : > { %v1446_v13 = vpop.permute.xlu1 %1445 }
 0x208   : > { %v1448_v43 = vpop.permute.xlu0 %1447 }
 0x209   : > { %1822 = vrot.lane.b32.xlu1 %v3862_v11, %s2760_s11 }
 0x20a   : > { %1824 = vrot.lane.b32.xlu0 %v1774_v10, %s2760_s11  ;;  %v1779_v10 = vmul.f32 0.13533528, %v3635_v45 }
 0x20b   : > { %v3871_v8 = vpop.permute.xlu1 %1461 }
 0x20c   : > { %4526 = vst [vmem:[#allocation35_spill] sm:$0xff] %v3871_v8  ;;  %v3874_v26 = vpop.permute.xlu0 %1463 }
 0x20d   : > { %4527 = vst [vmem:[#allocation36_spill] sm:$0xff] %v3874_v26  ;;  %1826 = vrot.lane.b32.xlu1 %v3869_v17, %s2760_s11  ;;  %v1516_v26 = vadd.f32 %v1486_v42, %v1335_v30  ;;  %v1784_v30 = vmul.f32 0.13533528, %v3659_v28  ;;  %v1626_v28 = vsel %vm1621_vm14, %v3744_v59, %v3747_v37  ;;  %v1627_v59 = vsel %vm1621_vm14, %v3754_v46, %v3759_v3 }
 0x20e   : > { %1828 = vrot.lane.b32.xlu0 %v1775_v44, %s2760_s11  ;;  %v3891_v44 = vmul.f32 0.13533528, %v3587_v63  ;;  %v3906_v63 = vmul.f32 0.13533528, %v3657_v38 }
 0x20f   : > { %v1466_v41 = vpop.permute.xlu1 %1465  ;;  %v1652_v6 = vadd.f32 %v1622_v51, %v1516_v26  ;;  %v1632_v51 = vsel %vm1621_vm14, %v3776_v47, %v3779_v33 }
 0x210   : > { %v1468_v53 = vpop.permute.xlu0 %1467 }
 0x211   : > { %1842 = vrot.lane.b32.xlu1 %v3880_v50, %s2760_s11 }
 0x212   : > { %1844 = vrot.lane.b32.xlu0 %v1779_v10, %s2760_s11 }
 0x213   : > { %v1482_v8 = vpop.permute.xlu1 %1481 }
 0x214   : > { %v1484_v45 = vpop.permute.xlu0 %1483 }
 0x215   : > { %v1500_v49 = vsel %vm1485_vm13, %v1482_v8, %v1484_v45  ;;  %1846 = vrot.lane.b32.xlu1 %v3888_v55, %s2760_s11  ;;  %v1491_v8 = vsel %vm1485_vm13, %v1446_v13, %v1448_v43  ;;  %v1656_v43 = vadd.f32 %v1626_v28, %v1520_v35  ;;  %v1776_v35 = vmul.f32 0.13533528, %v3627_v58 }
 0x216   : > { %v3902_v1 = vadd.f32 %v1500_v49, %v3891_v44  ;;  %1848 = vrot.lane.b32.xlu0 %v1780_v21, %s2760_s11  ;;  %v1521_v13 = vadd.f32 %v1491_v8, %v3837_v29  ;;  %v1496_v21 = vsel %vm1485_vm13, %v1466_v41, %v1468_v53  ;;  %v1786_v28 = vmul.f32 0.13533528, %v3675_v19 }
 0x217   : > { %v1668_v42 = vpop.permute.xlu1 %1667  ;;  %v1526_v29 = vadd.f32 %v1496_v21, %v3848_v61  ;;  %v3985_v19 = vmul.f32 0.13533528, %v3471_v32  ;;  %v4528_v32 = vld [vmem:[#allocation25_spill] sm:$0xff] }
 0x218   : > { %v1670_v36 = vpop.permute.xlu0 %1669  ;;  %v1657_v37 = vadd.f32 %v1627_v59, %v1521_v13  ;;  %v2593_v13 = vld [vmem:[#allocation2 + $0x48] sm:$0x3] }
 0x219   : > { %v1728_v10 = vsel %vm1727_vm15, %v1668_v42, %v1670_v36  ;;  %1862 = vrot.lane.b32.xlu1 %v3906_v63, %s2760_s11  ;;  %v1662_v3 = vadd.f32 %v1632_v51, %v1526_v29 }
 0x21a   : > { %v3917_v38 = vadd.f32 %v1728_v10, %v1652_v6  ;;  %1864 = vrot.lane.b32.xlu0 %v1784_v30, %s2760_s11 }
 0x21b   : > { %v1684_v14 = vpop.permute.xlu1 %1683 }
 0x21c   : > { %v1686_v26 = vpop.permute.xlu0 %1685 }
 0x21d   : > { %v1732_v45 = vsel %vm1727_vm15, %v1684_v14, %v1686_v26  ;;  %1866 = vrot.lane.b32.xlu1 %v3921_v52, %s2760_s11 }
 0x21e   : > { %v3932_v24 = vadd.f32 %v1732_v45, %v1656_v43  ;;  %1868 = vrot.lane.b32.xlu0 %v1785_v56, %s2760_s11  ;;  %v1777_v43 = vmul.f32 0.13533528, %v2593_v13  ;;  %v1782_v45 = vmul.f32 0.13533528, %v3457_v60 }
 0x21f   : > { %v1688_v4 = vpop.permute.xlu1 %1687 }
 0x220   : > { %v1690_v49 = vpop.permute.xlu0 %1689 }
 0x221   : > { %v1733_v41 = vsel %vm1727_vm15, %v1688_v4, %v1690_v49  ;;  %1703 = vrot.lane.b32.xlu1 %v3694_v27, %s2759_s10  ;;  %v1338_v27 = vmul.f32 0.13533528, %v3625_v18  ;;  %v2761_v4 = vmov 0  }
 0x222   : > { %v3942_v53 = vadd.f32 %v1733_v41, %v1657_v37  ;;  %1705 = vrot.lane.b32.xlu0 %v3697_v0, %s2759_s10  ;;  %2543 = vset.pattern.permute.xlu1 %v2761_v4  ;;  %v1787_v37 = vmul.f32 0.13533528, %v4528_v32 }
 0x223   : > { %v1710_v46 = vpop.permute.xlu1 %1709  ;;  %2544 = vset.pattern.permute.xlu0 %v2761_v4 }
 0x224   : > { %v1708_v42 = vpop.permute.xlu0 %1707 }
 0x225   : > { %v1738_v61 = vsel %vm1727_vm15, %v1708_v42, %v1710_v46  ;;  %1723 = vrot.lane.b32.xlu1 %v3708_v57, %s2759_s10  ;;  %v1343_v57 = vmul.f32 0.13533528, %v3649_v39 }
 0x226   : > { %v3952_v30 = vadd.f32 %v1738_v61, %v1662_v3  ;;  %1725 = vrot.lane.b32.xlu0 %v3711_v5, %s2759_s10  ;;  %v1781_v5 = vmul.f32 0.13533528, %v3651_v12  ;;  %s2630_s10 = scalar_lea.vmem %s2629_s8, 3072 }
 0x227   : > { %v1430_v0 = vpop.permute.xlu1 %1429  ;;  %p2632_p0 = scmp.lt.s32.totalorder %s2630_s10, %s2624_s6 }
 0x228   : > { %v1432_v6 = vpop.permute.xlu0 %1431 }
 0x229   : > { %v1487_v33 = vsel %vm1485_vm13, %v1430_v0, %v1432_v6  ;;  %1830 = vrot.lane.b32.xlu1 %v1338_v27, %s2760_s11  ;;  %p2633_p2 = por %p2632_p0, %p2631_p10 }
 0x22a   : > { %v3961_v47 = vadd.f32 %v1487_v33, %v3862_v11  ;;  %1832 = vrot.lane.b32.xlu0 %v1776_v35, %s2760_s11  ;;  %v1348_v11 = vmul.f32 0.13533528, %v3673_v9 }
 0x22b   : > { %v1434_v36 = vpop.permute.xlu1 %1433  ;;  %p2634_p4 = pnand %p2633_p2, %p2627_p8 }
 0x22c   : > { %v1436_v8 = vpop.permute.xlu0 %1435 }
 0x22d   : > { %v1488_v18 = vsel %vm1485_vm13, %v1434_v36, %v1436_v8  ;;  %1850 = vrot.lane.b32.xlu1 %v1343_v57, %s2760_s11 }
 0x22e   : > { %v3969_v58 = vadd.f32 %v1488_v18, %v3869_v17  ;;  %1852 = vrot.lane.b32.xlu0 %v1781_v5, %s2760_s11 }
 0x22f   : > { %v1438_v10 = vpop.permute.xlu1 %1437 }
 0x230   : > { %v1440_v14 = vpop.permute.xlu0 %1439 }
 0x231   : > { %v1489_v39 = vsel %vm1485_vm13, %v1438_v10, %v1440_v14  ;;  %1870 = vrot.lane.b32.xlu1 %v1348_v11, %s2760_s11 }
 0x232   : > { %v1519_v12 = vadd.f32 %v1489_v39, %v1338_v27  ;;  %1872 = vrot.lane.b32.xlu0 %v1786_v28, %s2760_s11 }
 0x233   : > { %v1450_v56 = vpop.permute.xlu1 %1449 }
 0x234   : > { %v1452_v17 = vpop.permute.xlu0 %1451 }
 0x235   : > { %v1492_v26 = vsel %vm1485_vm13, %v1450_v56, %v1452_v17  ;;  %1834 = vrot.lane.b32.xlu1 %v3899_v48, %s2760_s11 }
 0x236   : > { %v3981_v9 = vadd.f32 %v1492_v26, %v3880_v50  ;;  %1836 = vrot.lane.b32.xlu0 %v1777_v43, %s2760_s11 }
 0x237   : > { %v1454_v21 = vpop.permute.xlu1 %1453 }
 0x238   : > { %v1456_v59 = vpop.permute.xlu0 %1455 }
 0x239   : > { %v1493_v29 = vsel %vm1485_vm13, %v1454_v21, %v1456_v59  ;;  %1854 = vrot.lane.b32.xlu1 %v3985_v19, %s2760_s11 }
 0x23a   : > { %v3992_v50 = vadd.f32 %v1493_v29, %v3888_v55  ;;  %1856 = vrot.lane.b32.xlu0 %v1782_v45, %s2760_s11 }
 0x23b   : > { %v1458_v48 = vpop.permute.xlu1 %1457 }
 0x23c   : > { %v1460_v49 = vpop.permute.xlu0 %1459 }
 0x23d   : > { %v1494_v60 = vsel %vm1485_vm13, %v1458_v48, %v1460_v49  ;;  %1874 = vrot.lane.b32.xlu1 %v3891_v44, %s2760_s11 }
 0x23e   : > { %v3999_v41 = vadd.f32 %v1494_v60, %v1343_v57  ;;  %1876 = vrot.lane.b32.xlu0 %v1787_v37, %s2760_s11  ;;  %v4529_v37 = vmov 0.0   ;;  %s4271_s11 = scalar_lea.hbm %s4422_s2, %s2467_s23 }
 0x23f   : > { %v1470_v51 = vpop.permute.xlu1 %1469 }
 0x240   : > { %v1472_v46 = vpop.permute.xlu0 %1471 }
 0x241   : > { %v1497_v55 = vsel %vm1485_vm13, %v1470_v51, %v1472_v46 }
 0x242   : > { %v4004_v3 = vadd.f32 %v1497_v55, %v3906_v63  ;;  %v1625_v63 = vsel %vm1621_vm14, %v3802_v31, %v3804_v2 }
 0x243   : > { %v1474_v42 = vpop.permute.xlu1 %1473  ;;  %v1655_v10 = vadd.f32 %v1625_v63, %v1519_v12 }
 0x244   : > { %v1476_v61 = vpop.permute.xlu0 %1475 }
 0x245   : > { %v1498_v27 = vsel %vm1485_vm13, %v1474_v42, %v1476_v61 }
 0x246   : > { %v4008_v0 = vadd.f32 %v1498_v27, %v3921_v52 }
 0x247   : > { %v1478_v35 = vpop.permute.xlu1 %1477 }
 0x248   : > { %v1480_v44 = vpop.permute.xlu0 %1479 }
 0x249   : > { %v1499_v6 = vsel %vm1485_vm13, %v1478_v35, %v1480_v44 }
 0x24a   : > { %v4011_v33 = vadd.f32 %v1499_v6, %v1348_v11 }
 0x24b   : > { %v1672_v57 = vpop.permute.xlu1 %1671 }
 0x24c   : > { %v1674_v36 = vpop.permute.xlu0 %1673 }
 0x24d   : > { %v1729_v35 = vsel %vm1727_vm15, %v1672_v57, %v1674_v36 }
 0x24f   : > { %v1676_v5 = vpop.permute.xlu1 %1675 }
 0x250   : > { %v1678_v8 = vpop.permute.xlu0 %1677 }
 0x253   : > { %v1680_v18 = vpop.permute.xlu1 %1679 }
 0x254   : > { %v1682_v28 = vpop.permute.xlu0 %1681 }
 0x255   : > { %v1731_v52 = vsel %vm1727_vm15, %v1680_v18, %v1682_v28  ;;  %v1730_v28 = vsel %vm1727_vm15, %v1676_v5, %v1678_v8 }
 0x256   : > { %v4017_v14 = vadd.f32 %v1731_v52, %v1655_v10  ;;  %v1624_v10 = vsel %vm1621_vm14, %v3796_v20, %v3798_v16 }
 0x257   : > { %v1692_v39 = vpop.permute.xlu1 %1691 }
 0x258   : > { %v1694_v56 = vpop.permute.xlu0 %1693 }
 0x259   : > { %v1734_v36 = vsel %vm1727_vm15, %v1692_v39, %v1694_v56 }
 0x25b   : > { %v1696_v13 = vpop.permute.xlu1 %1695 }
 0x25c   : > { %v1698_v11 = vpop.permute.xlu0 %1697 }
 0x25f   : > { %v4019_v43 = vpop.permute.xlu1 %1699 }
 0x260   : > { %v4021_v17 = vpop.permute.xlu0 %1711 }
 0x263   : > { %v4023_v26 = vpop.permute.xlu1 %1713 }
 0x264   : > { %v4025_v21 = vpop.permute.xlu0 %1715 }
 0x267   : > { %v4027_v31 = vpop.permute.xlu1 %1717 }
 0x268   : > { %v1819_v2 = vpop.permute.xlu0 %1818 }
 0x26b   : > { %v1821_v12 = vpop.permute.xlu1 %1820 }
 0x26c   : > { %v1879_v45 = vsel %vm1878_vm0, %v1819_v2, %v1821_v12  ;;  %v1839_v59 = vpop.permute.xlu0 %1838  ;;  %v1654_v2 = vadd.f32 %v1624_v10, %v3969_v58 }
 0x26d   : > { %v1909_v4 = vadd.f32 %v1879_v45, %v3917_v38 }
 0x26f   : > { %vm1924_vm3 = vcmp.gt.f32.partialorder %v1909_v4, 0.5  ;;  %v1841_v29 = vpop.permute.xlu1 %1840 }
 0x270   : > { %v1884_v48 = vsel %vm1878_vm0, %v1839_v59, %v1841_v29  ;;  %v1859_v32 = vpop.permute.xlu0 %1858  ;;  %v4033_v49 = vsel %vm1924_vm3, 1.0, %v4529_v37 }
 0x271   : > { %v1914_v60 = vadd.f32 %v1884_v48, %v3942_v53  ;;  %v1970_v51 = vsel %vm1969_vm1, %v4033_v49, 0.0  ;;  %v1623_v53 = vsel %vm1621_vm14, %v3790_v22, %v3792_v54  ;;  %v1760_v22 = vadd.f32 %v1730_v28, %v1654_v2 }
 0x272   : > { %1971 = vadd.xlane.f32.xlu1 %v1970_v51  ;;  %v1653_v44 = vadd.f32 %v1623_v53, %v3961_v47  ;;  %v1628_v47 = vsel %vm1621_vm14, %v3808_v7, %v3810_v62  ;;  %v1629_v7 = vsel %vm1621_vm14, %v3814_v34, %v3816_v15  ;;  %v1735_v62 = vsel %vm1727_vm15, %v1696_v13, %v1698_v11 }
 0x273   : > { %vm1929_vm4 = vcmp.gt.f32.partialorder %v1914_v60, 0.5  ;;  %v1861_v46 = vpop.permute.xlu1 %1860  ;;  %v1658_v58 = vadd.f32 %v1628_v47, %v3981_v9  ;;  %v1659_v9 = vadd.f32 %v1629_v7, %v3992_v50  ;;  %v1633_v34 = vsel %vm1621_vm14, %v3826_v40, %v3829_v25  ;;  %v4530_v40 = vld [vmem:[#allocation32_spill] sm:$0xff]  ;;  %v4532_v47 = vld [vmem:[#allocation30_spill] sm:$0xff] }
 0x274   : > { %v4038_v55 = vpop.permute.xlu0 %1701  ;;  %v4041_v38 = vsel %vm1929_vm4, 1.0, %v4529_v37  ;;  %v1759_v63 = vadd.f32 %v1729_v35, %v1653_v44  ;;  %v1889_v54 = vsel %vm1878_vm0, %v1859_v32, %v1861_v46  ;;  %v1739_v15 = vsel %vm1727_vm15, %v4021_v17, %v4023_v26  ;;  %v4533_v7 = vld [vmem:[#allocation34_spill] sm:$0xff] }
 0x275   : > { %v1982_v42 = vsel %vm1969_vm1, %v4041_v38, 0.0  ;;  %v1919_v8 = vadd.f32 %v1889_v54, %v3952_v30  ;;  %v1764_v4 = vadd.f32 %v1734_v36, %v1658_v58  ;;  %v1765_v32 = vadd.f32 %v1735_v62, %v1659_v9  ;;  %v4534_v62 = vld [vmem:[#allocation33_spill] sm:$0xff] }
 0x276   : > { %1983 = vadd.xlane.f32.xlu1 %v1982_v42  ;;  %v1663_v11 = vadd.f32 %v1633_v34, %v4004_v3  ;;  %v1634_v25 = vsel %vm1621_vm14, %v4530_v40, %v3839_v23  ;;  %v1740_v26 = vsel %vm1727_vm15, %v4025_v21, %v4027_v31  ;;  %v4538_v40 = vld [vmem:[#allocation26_spill] sm:$0xff] }
 0x277   : > { %v4045_v61 = vpop.permute.xlu1 %1719  ;;  %vm1934_vm7 = vcmp.gt.f32.partialorder %v1919_v8, 0.5 }
 0x278   : > { %v4047_v27 = vpop.permute.xlu0 %1721  ;;  %v4095_v46 = vsel %vm1934_vm7, 1.0, %v4529_v37  ;;  %v1769_v53 = vadd.f32 %v1739_v15, %v1663_v11 }
 0x279   : > { %v1994_v35 = vsel %vm1969_vm1, %v4095_v46, 0.0  ;;  %v1741_v9 = vsel %vm1727_vm15, %v4045_v61, %v4047_v27 }
 0x27b   : > { %v1823_v6 = vpop.permute.xlu1 %1822 }
 0x27c   : > { %v1825_v18 = vpop.permute.xlu0 %1824 }
 0x27d   : > { %v1880_v52 = vsel %vm1878_vm0, %v1823_v6, %v1825_v18  ;;  %v1664_v6 = vadd.f32 %v1634_v25, %v4008_v0 }
 0x27e   : > { %v1910_v12 = vadd.f32 %v1880_v52, %v1759_v63 }
 0x27f   : > { %v1827_v45 = vpop.permute.xlu1 %1826  ;;  %v1770_v18 = vadd.f32 %v1740_v26, %v1664_v6 }
 0x280   : > { %v1829_v57 = vpop.permute.xlu0 %1828  ;;  %vm1925_vm5 = vcmp.gt.f32.partialorder %v1910_v12, 0.5 }
 0x281   : > { %v1881_v16 = vsel %vm1878_vm0, %v1827_v45, %v1829_v57  ;;  %v4067_v20 = vsel %vm1925_vm5, 1.0, %v4529_v37  ;;  %v4531_v57 = vld [vmem:[#allocation31_spill] sm:$0xff] }
 0x282   : > { %v1911_v5 = vadd.f32 %v1881_v16, %v1760_v22  ;;  %1973 = vadd.xlane.f32.xlu0 %v4067_v20  ;;  %v1630_v36 = vsel %vm1621_vm14, %v4532_v47, %v4531_v57  ;;  %v1736_v16 = vsel %vm1727_vm15, %v4019_v43, %v4038_v55 }
 0x283   : > { %v1843_v59 = vpop.permute.xlu1 %1842 }
 0x284   : > { %v1845_v29 = vpop.permute.xlu0 %1844  ;;  %vm1926_vm6 = vcmp.gt.f32.partialorder %v1911_v5, 0.5  ;;  %v1660_v5 = vadd.f32 %v1630_v36, %v3999_v41 }
 0x285   : > { %v1885_v39 = vsel %vm1878_vm0, %v1843_v59, %v1845_v29  ;;  %v4078_v56 = vsel %vm1926_vm6, 1.0, %v4529_v37 }
 0x286   : > { %v1915_v48 = vadd.f32 %v1885_v39, %v1764_v4  ;;  %1975 = vadd.xlane.f32.xlu0 %v4078_v56  ;;  %v1766_v4 = vadd.f32 %v1736_v16, %v1660_v5  ;;  %v1635_v39 = vsel %vm1621_vm14, %v4534_v62, %v4533_v7  ;;  %v2450_v5 = vld [vmem:[%s253_s5] ss:$0 sm:$0xff] }
 0x287   : > { %v1847_v30 = vpop.permute.xlu1 %1846  ;;  %v1665_v41 = vadd.f32 %v1635_v39, %v4011_v33 }
 0x288   : > { %v1849_v60 = vpop.permute.xlu0 %1848  ;;  %vm1930_vm8 = vcmp.gt.f32.partialorder %v1915_v48, 0.5  ;;  %v4535_v48 = vld [vmem:[#allocation36_spill] sm:$0xff] }
 0x289   : > { %v1886_v13 = vsel %vm1878_vm0, %v1847_v30, %v1849_v60  ;;  %v4090_v50 = vsel %vm1930_vm8, 1.0, %v4529_v37  ;;  %v4536_v30 = vld [vmem:[#allocation35_spill] sm:$0xff]  ;;  %v1771_v34 = vadd.f32 %v1741_v9, %v1665_v41 }
 0x28a   : > { %v1916_v51 = vadd.f32 %v1886_v13, %v1765_v32  ;;  %1985 = vadd.xlane.f32.xlu0 %v4090_v50  ;;  %v1495_v32 = vsel %vm1485_vm13, %v4536_v30, %v4535_v48 }
 0x28b   : > { %v1863_v42 = vpop.permute.xlu1 %1862  ;;  %v1525_v13 = vadd.f32 %v1495_v32, %v3985_v19 }
 0x28c   : > { %v1865_v17 = vpop.permute.xlu0 %1864  ;;  %vm1931_vm9 = vcmp.gt.f32.partialorder %v1916_v51, 0.5 }
 0x28d   : > { %v1890_v3 = vsel %vm1878_vm0, %v1863_v42, %v1865_v17  ;;  %v4107_v44 = vsel %vm1931_vm9, 1.0, %v4529_v37  ;;  %v4537_v42 = vld [vmem:[#allocation27_spill] sm:$0xff] }
 0x28e   : > { %v1920_v63 = vadd.f32 %v1890_v3, %v1769_v53  ;;  %1995 = vadd.xlane.f32.xlu0 %v1994_v35  ;;  %1987 = vadd.xlane.f32.xlu1 %v4107_v44  ;;  %v1631_v25 = vsel %vm1621_vm14, %v4538_v40, %v4537_v42 }
 0x28f   : > { %v1867_v23 = vpop.permute.xlu1 %1866  ;;  %v1661_v3 = vadd.f32 %v1631_v25, %v1525_v13 }
 0x290   : > { %v1869_v10 = vpop.permute.xlu0 %1868  ;;  %vm1935_vm11 = vcmp.gt.f32.partialorder %v1920_v63, 0.5 }
 0x291   : > { %v1891_v21 = vsel %vm1878_vm0, %v1867_v23, %v1869_v10  ;;  %v4113_v31 = vsel %vm1935_vm11, 1.0, %v4529_v37  ;;  %v4539_v23 = vld [vmem:[#allocation29_spill] sm:$0xff] }
 0x292   : > { %v1921_v28 = vadd.f32 %v1891_v21, %v1770_v18  ;;  %1997 = vadd.xlane.f32.xlu1 %v4113_v31  ;;  %v4540_v18 = vld [vmem:[#allocation28_spill] sm:$0xff] }
 0x293   : > { %v1704_v52 = vpop.permute.xlu1 %1703  ;;  %v1636_v10 = vsel %vm1621_vm14, %v4540_v18, %v4539_v23 }
 0x294   : > { %v1706_v2 = vpop.permute.xlu0 %1705  ;;  %vm1936_vm12 = vcmp.gt.f32.partialorder %v1921_v28, 0.5 }
 0x295   : > { %v4117_v0 = vsel %vm1936_vm12, 1.0, %v4529_v37  ;;  %v1737_v53 = vsel %vm1727_vm15, %v1704_v52, %v1706_v2 }
 0x296   : > { %1999 = vadd.xlane.f32.xlu0 %v4117_v0  ;;  %v1767_v6 = vadd.f32 %v1737_v53, %v1661_v3 }
 0x297   : > { %v1724_v12 = vpop.permute.xlu1 %1723 }
 0x298   : > { %v1726_v45 = vpop.permute.xlu0 %1725 }
 0x299   : > { %v1742_v21 = vsel %vm1727_vm15, %v1724_v12, %v1726_v45 }
 0x29b   : > { %v1831_v22 = vpop.permute.xlu1 %1830 }
 0x29c   : > { %v1833_v54 = vpop.permute.xlu0 %1832 }
 0x29d   : > { %v1882_v58 = vsel %vm1878_vm0, %v1831_v22, %v1833_v54 }
 0x29e   : > { %v1912_v8 = vadd.f32 %v1882_v58, %v4017_v14 }
 0x29f   : > { %v1851_v59 = vpop.permute.xlu1 %1850 }
 0x2a0   : > { %v1853_v29 = vpop.permute.xlu0 %1852  ;;  %vm1927_vm1 = vcmp.gt.f32.partialorder %v1912_v8, 0.5  ;;  %v2452_v8 = vld [vmem:[%s253_s5 + $0x2] ss:$0 sm:$0xff] }
 0x2a1   : > { %v1887_v43 = vsel %vm1878_vm0, %v1851_v59, %v1853_v29  ;;  %v4137_v55 = vsel %vm1927_vm1, 1.0, %v4529_v37  ;;  %v2451_v59 = vld [vmem:[%s253_s5 + $0x1] ss:$0 sm:$0xff]  ;;  %s2229_s5 = scalar_lea.sflag [#allocation5], %s2894_s13 }
 0x2a2   : > { %v1917_v14 = vadd.f32 %v1887_v43, %v1766_v4  ;;  %1977 = vadd.xlane.f32.xlu1 %v4137_v55 }
 0x2a3   : > { %v1871_v60 = vpop.permute.xlu1 %1870 }
 0x2a4   : > { %v1873_v15 = vpop.permute.xlu0 %1872  ;;  %vm1932_vm3 = vcmp.gt.f32.partialorder %v1917_v14, 0.5 }
 0x2a5   : > { %v1892_v61 = vsel %vm1878_vm0, %v1871_v60, %v1873_v15  ;;  %v4146_v27 = vsel %vm1932_vm3, 1.0, %v4529_v37 }
 0x2a6   : > { %v1922_v11 = vadd.f32 %v1892_v61, %v1771_v34  ;;  %1989 = vadd.xlane.f32.xlu0 %v4146_v27 }
 0x2a7   : > { %v1835_v33 = vpop.permute.xlu1 %1834 }
 0x2a8   : > { %v1837_v51 = vpop.permute.xlu0 %1836  ;;  %vm1937_vm4 = vcmp.gt.f32.partialorder %v1922_v11, 0.5 }
 0x2a9   : > { %v1883_v17 = vsel %vm1878_vm0, %v1835_v33, %v1837_v51  ;;  %v4156_v26 = vsel %vm1937_vm4, 1.0, %v4529_v37 }
 0x2aa   : > { %v1913_v19 = vadd.f32 %v1883_v17, %v3932_v24  ;;  %2001 = vadd.xlane.f32.xlu1 %v4156_v26  ;;  %v1666_v24 = vadd.f32 %v1636_v10, %v3902_v1 }
 0x2ab   : > { %v1855_v35 = vpop.permute.xlu1 %1854 }
 0x2ac   : > { %vm1928_vm13 = vcmp.gt.f32.partialorder %v1913_v19, 0.5  ;;  %v1857_v63 = vpop.permute.xlu0 %1856  ;;  %v1772_v57 = vadd.f32 %v1742_v21, %v1666_v24 }
 0x2ad   : > { %v1888_v28 = vsel %vm1878_vm0, %v1855_v35, %v1857_v63  ;;  %v4166_v52 = vsel %vm1928_vm13, 1.0, %v4529_v37 }
 0x2ae   : > { %v1918_v2 = vadd.f32 %v1888_v28, %v1767_v6  ;;  %v1979_v22 = vsel %vm397_vm2, %v4166_v52, 0.0 }
 0x2af   : > { %1980 = vadd.xlane.f32.xlu0 %v1979_v22  ;;  %v1875_v54 = vpop.permute.xlu1 %1874 }
 0x2b0   : > { %vm1933_vm5 = vcmp.gt.f32.partialorder %v1918_v2, 0.5  ;;  %v1877_v47 = vpop.permute.xlu0 %1876 }
 0x2b1   : > { %v1893_v36 = vsel %vm1878_vm0, %v1875_v54, %v1877_v47  ;;  %v4173_v12 = vsel %vm1933_vm5, 1.0, %v4529_v37 }
 0x2b2   : > { %v1923_v45 = vadd.f32 %v1893_v36, %v1772_v57  ;;  %v1991_v16 = vsel %vm397_vm2, %v4173_v12, 0.0 }
 0x2b3   : > { %1992 = vadd.xlane.f32.xlu1 %v1991_v16 }
 0x2b4   : > { %vm1938_vm14 = vcmp.gt.f32.partialorder %v1923_v45, 0.5 }
 0x2b5   : > { %v4179_v1 = vsel %vm1938_vm14, 1.0, %v4529_v37 }
 0x2b6   : > { %v2003_v58 = vsel %vm397_vm2, %v4179_v1, 0.0 }
 0x2b7   : > { %2004 = vadd.xlane.f32.xlu0 %v2003_v58 }
 0x2c4   : > { %2109 = vperm.xlu1 %2543, %v2450_v5  }
 0x2c8   : > { %2117 = vperm.xlu1 %2543, %v2452_v8  }
 0x2cd   : > { %2113 = vperm.xlu0 %2544, %v2451_v59  }
 0x2ff   : > { %v1972_v29 = vpop.xlane.xlu1 %1971 }
 0x300   : > { %v2021_v34 = vrot.slane %v1972_v29, 2 }
 0x303   : > { %v1984_v7 = vpop.xlane.xlu1 %1983 }
 0x304   : > { %v2030_v25 = vrot.slane %v1984_v7, 2 }
 0x30f   : > { %v1974_v4 = vpop.xlane.xlu0 %1973 }
 0x310   : > { %v2022_v30 = vrot.slane %v1974_v4, 2 }
 0x312   : > { %v2023_v33 = vsel %vm795_vm10, %v2021_v34, %v2022_v30 }
 0x313   : > { %v1976_v37 = vpop.xlane.xlu0 %1975 }
 0x314   : > { %v2024_v48 = vrot.slane %v1976_v37, 2 }
 0x316   : > { %v2025_v15 = vsel %vm795_vm10, %v2022_v30, %v2024_v48 }
 0x317   : > { %v1986_v62 = vpop.xlane.xlu0 %1985  ;;  %v2060_v53 = vadd.f32 %v2025_v15, %v2023_v33 }
 0x318   : > { %v2031_v13 = vrot.slane %v1986_v62, 2 }
 0x31a   : > { %v2032_v63 = vsel %vm795_vm10, %v2030_v25, %v2031_v13  ;;  %v4542_v25 = vld [vmem:[#allocation17_spill] sm:$0xff] }
 0x31b   : > { %v1988_v39 = vpop.xlane.xlu1 %1987  ;;  %v1996_v9 = vpop.xlane.xlu0 %1995 }
 0x31c   : > { %v2033_v61 = vrot.slane %v1988_v39, 2  ;;  %v2039_v18 = vrot.slane %v1996_v9, 2 }
 0x31e   : > { %v2034_v3 = vsel %vm795_vm10, %v2031_v13, %v2033_v61 }
 0x31f   : > { %v1998_v43 = vpop.xlane.xlu1 %1997  ;;  %v2069_v24 = vadd.f32 %v2034_v3, %v2032_v63 }
 0x320   : > { %v2040_v19 = vrot.slane %v1998_v43, 2 }
 0x322   : > { %v2041_v54 = vsel %vm795_vm10, %v2039_v18, %v2040_v19 }
 0x323   : > { %v2000_v41 = vpop.xlane.xlu0 %1999 }
 0x324   : > { %v2042_v51 = vrot.slane %v2000_v41, 2 }
 0x326   : > { %v2043_v10 = vsel %vm795_vm10, %v2040_v19, %v2042_v51  ;;  %v4544_v19 = vld [vmem:[#allocation16_spill] sm:$0xff] }
 0x327   : > { %v2078_v36 = vadd.f32 %v2043_v10, %v2041_v54 }
 0x32f   : > { %v1978_v14 = vpop.xlane.xlu1 %1977 }
 0x330   : > { %v2026_v32 = vrot.slane %v1978_v14, 2 }
 0x332   : > { %v2027_v42 = vsel %vm795_vm10, %v2024_v48, %v2026_v32 }
 0x333   : > { %v1990_v60 = vpop.xlane.xlu0 %1989  ;;  %v2061_v23 = vadd.f32 %v2060_v53, %v2027_v42  ;;  %v4541_v42 = vld [vmem:[#allocation14_spill] sm:$0xff] }
 0x334   : > { %v2035_v40 = vrot.slane %v1990_v60, 2 }
 0x336   : > { %v2036_v21 = vsel %vm795_vm10, %v2033_v61, %v2035_v40 }
 0x337   : > { %v2002_v11 = vpop.xlane.xlu1 %2001  ;;  %v2070_v45 = vadd.f32 %v2069_v24, %v2036_v21 }
 0x338   : > { %v2044_v35 = vrot.slane %v2002_v11, 2 }
 0x33a   : > { %v2045_v57 = vsel %vm795_vm10, %v2042_v51, %v2044_v35 }
 0x33b   : > { %v2079_v5 = vadd.f32 %v2078_v36, %v2045_v57 }
 0x33c   : > { %v1981_v17 = vpop.xlane.xlu0 %1980 }
 0x33d   : > { %v2028_v6 = vrot.slane %v1981_v17, 2  ;;  %v4543_v17 = vld [vmem:[#allocation18_spill] sm:$0xff] }
 0x33f   : > { %v2029_v28 = vsel %vm795_vm10, %v2026_v32, %v2028_v6 }
 0x340   : > { %v2062_v2 = vadd.f32 %v2061_v23, %v2029_v28  ;;  %v1993_v22 = vpop.xlane.xlu1 %1992 }
 0x341   : > { %v2037_v47 = vrot.slane %v1993_v22, 2 }
 0x342   : > { %v2063_v16 = vrot.slane %v2062_v2, 4 }
 0x343   : > { %v2038_v58 = vsel %vm795_vm10, %v2035_v40, %v2037_v47 }
 0x344   : > { %v2064_v8 = vadd.f32 %v2063_v16, %v2062_v2  ;;  %v2071_v59 = vadd.f32 %v2070_v45, %v2038_v58  ;;  %v2110_v4 = vpop.permute.xlu1 %2109  ;;  %v2005_v29 = vpop.xlane.xlu0 %2004 }
 0x345   : > { %v2120_v37 = vmax.f32 %v4033_v49, %v2110_v4  ;;  %v2121_v7 = vmax.f32 %v4067_v20, %v2110_v4  ;;  %v2122_v62 = vmax.f32 %v4078_v56, %v2110_v4  ;;  %v2123_v39 = vmax.f32 %v4137_v55, %v2110_v4 }
 0x346   : > { %v2065_v9 = vrot.slane %v2064_v8, 2  ;;  %v2072_v43 = vrot.slane %v2071_v59, 4  ;;  %v2124_v41 = vmax.f32 %v4166_v52, %v2110_v4  ;;  %v2046_v14 = vrot.slane %v2005_v29, 2  ;;  %v4545_v4 = vld [vmem:[#allocation19_spill] sm:$0xff] }
 0x347   : > { %2135 = vst [vmem:[%s4206_s12 - $0x2] sm:$0xfc] %v2120_v37  ;;  %2136 = vst [vmem:[%s4206_s12 + $0x6] sm:$0xff] %v2121_v7  ;;  %v2165_v49 = vrot.slane %v2120_v37, 2  ;;  %v2166_v20 = vrot.slane %v2121_v7, 2  ;;  %v2168_v56 = vrot.slane %v2122_v62, 2 }
 0x348   : > { %2137 = vst [vmem:[%s4206_s12 + $0xe] sm:$0xff] %v2122_v62  ;;  %2138 = vst [vmem:[%s4206_s12 + $0x16] sm:$0xff] %v2123_v39  ;;  %v2170_v55 = vrot.slane %v2123_v39, 2  ;;  %v2066_v48 = vadd.f32 %v2065_v9, %v2064_v8  ;;  %v2073_v52 = vadd.f32 %v2072_v43, %v2071_v59  ;;  %v2172_v30 = vrot.slane %v2124_v41, 2  ;;  %v2118_v13 = vpop.permute.xlu1 %2117  ;;  %v4546_v29 = vld [vmem:[#allocation23_spill] sm:$0xff]  ;;  %v4547_v37 = vld [vmem:[#allocation24_spill] sm:$0xff] }
 0x349   : > { %2139 = vst [vmem:[%s4206_s12 + $0x1e] sm:$0x3] %v2124_v41  ;;  %v2047_v32 = vsel %vm795_vm10, %v2044_v35, %v2046_v14  ;;  %v2167_v60 = vsel %vm795_vm10, %v2165_v49, %v2166_v20  ;;  %v2169_v34 = vsel %vm795_vm10, %v2166_v20, %v2168_v56  ;;  %v2130_v18 = vmax.f32 %v4095_v46, %v2118_v13  ;;  %v4548_v62 = vld [vmem:[#allocation20_spill] sm:$0xff] }
 0x34a   : > { %v2171_v15 = vsel %vm795_vm10, %v2168_v56, %v2170_v55  ;;  %v2080_v61 = vadd.f32 %v2079_v5, %v2047_v32  ;;  %v2067_v11 = vrot.slane %v2066_v48, 1  ;;  %v2074_v33 = vrot.slane %v2073_v52, 2 }
 0x34b   : > { %v2173_v51 = vsel %vm795_vm10, %v2170_v55, %v2172_v30  ;;  %v2204_v40 = vmul.f32 %v4541_v42, %v2167_v60  ;;  %v2205_v53 = vmul.f32 %v4542_v25, %v2169_v34  ;;  %v2206_v3 = vmul.f32 %v4543_v17, %v2171_v15  ;;  %2145 = vst [vmem:[%s4206_s12 + $0x3e] sm:$0xfc] %v2130_v18 }
 0x34c   : > { %v2207_v35 = vmul.f32 %v4544_v19, %v2173_v51  ;;  %v2081_v6 = vrot.slane %v2080_v61, 4  ;;  %v2068_v63 = vadd.f32 %v2067_v11, %v2066_v48  ;;  %v2075_v23 = vadd.f32 %v2074_v33, %v2073_v52  ;;  %v2114_v21 = vpop.permute.xlu0 %2113 }
 0x34d   : > { %2216 = vst [vmem:[%s4224_s14] sm:$0xff] %v2204_v40  ;;  %v2131_v10 = vmax.f32 %v4113_v31, %v2118_v13  ;;  %2217 = vst [vmem:[%s4224_s14 + $0x8] sm:$0xff] %v2205_v53  ;;  %v2132_v24 = vmax.f32 %v4117_v0, %v2118_v13  ;;  %v2133_v2 = vmax.f32 %v4156_v26, %v2118_v13  ;;  %v2183_v31 = vrot.slane %v2130_v18, 2 }
 0x34e   : > { %2218 = vst [vmem:[%s4224_s14 + $0x10] sm:$0xff] %v2206_v3  ;;  %2219 = vst [vmem:[%s4224_s14 + $0x18] sm:$0xff] %v2207_v35  ;;  %v2082_v28 = vadd.f32 %v2081_v6, %v2080_v61  ;;  %v2134_v22 = vmax.f32 %v4179_v1, %v2118_v13  ;;  %v2076_v46 = vrot.slane %v2075_v23, 1  ;;  %v2125_v57 = vmax.f32 %v4041_v38, %v2114_v21 }
 0x34f   : > { %2087 = vst [vmem:[%s4237_s22] sm:$0x1] %v2068_v63  ;;  %2146 = vst [vmem:[%s4206_s12 + $0x46] sm:$0xff] %v2131_v10  ;;  %v2184_v54 = vrot.slane %v2131_v10, 2  ;;  %v2186_v26 = vrot.slane %v2132_v24, 2  ;;  %v2188_v1 = vrot.slane %v2133_v2, 2  ;;  %v2126_v16 = vmax.f32 %v4090_v50, %v2114_v21 }
 0x350   : > { %v2083_v0 = vrot.slane %v2082_v28, 2  ;;  %2147 = vst [vmem:[%s4206_s12 + $0x4e] sm:$0xff] %v2132_v24  ;;  %2148 = vst [vmem:[%s4206_s12 + $0x56] sm:$0xff] %v2133_v2  ;;  %v2190_v47 = vrot.slane %v2134_v22, 2  ;;  %v2077_v36 = vadd.f32 %v2076_v46, %v2075_v23  ;;  %v4250_v38 = vmax.f32 %v4107_v44, %v2114_v21 }
 0x351   : > { %2149 = vst [vmem:[%s4206_s12 + $0x5e] sm:$0x3] %v2134_v22  ;;  %v2185_v45 = vsel %vm795_vm10, %v2183_v31, %v2184_v54  ;;  %2140 = vst [vmem:[%s4206_s12 + $0x1e] sm:$0xfc] %v2125_v57  ;;  %v2187_v5 = vsel %vm795_vm10, %v2184_v54, %v2186_v26  ;;  %v2189_v8 = vsel %vm795_vm10, %v2186_v26, %v2188_v1  ;;  %v2174_v14 = vrot.slane %v2125_v57, 2 }
 0x352   : > { %v2084_v58 = vadd.f32 %v2083_v0, %v2082_v28  ;;  %v2191_v59 = vsel %vm795_vm10, %v2188_v1, %v2190_v47  ;;  %2088 = vst [vmem:[%s4237_s22 + $0x1] sm:$0x1] %v2077_v36  ;;  %v2212_v50 = vmul.f32 %v4545_v4, %v2185_v45  ;;  %v2213_v44 = vmul.f32 %v4546_v29, %v2187_v5 }
 0x353   : > { %v2214_v7 = vmul.f32 %v4547_v37, %v2189_v8  ;;  %v2215_v39 = vmul.f32 %v4548_v62, %v2191_v59  ;;  %2141 = vst [vmem:[%s4206_s12 + $0x26] sm:$0xff] %v2126_v16  ;;  %2142 = vst [vmem:[%s4206_s12 + $0x2e] sm:$0xff] %v4250_v38  ;;  %v2128_v43 = vmax.f32 %v4146_v27, %v2114_v21  ;;  %v2175_v49 = vrot.slane %v2126_v16, 2 }
 0x354   : > { %v2085_v9 = vrot.slane %v2084_v58, 1  ;;  %v2129_v41 = vmax.f32 %v4173_v12, %v2114_v21  ;;  %2224 = vst [vmem:[%s4224_s14 + $0x40] sm:$0xff] %v2212_v50  ;;  %2225 = vst [vmem:[%s4224_s14 + $0x48] sm:$0xff] %v2213_v44  ;;  %v2177_v20 = vrot.slane %v4250_v38, 2 }
 0x355   : > { %2226 = vst [vmem:[%s4224_s14 + $0x50] sm:$0xff] %v2214_v7  ;;  %2227 = vst [vmem:[%s4224_s14 + $0x58] sm:$0xff] %v2215_v39  ;;  %v2179_v12 = vrot.slane %v2128_v43, 2  ;;  %v2176_v55 = vsel %vm795_vm10, %v2174_v14, %v2175_v49 }
 0x356   : > { %v2086_v27 = vadd.f32 %v2085_v9, %v2084_v58  ;;  %2143 = vst [vmem:[%s4206_s12 + $0x36] sm:$0xff] %v2128_v43  ;;  %2144 = vst [vmem:[%s4206_s12 + $0x3e] sm:$0x3] %v2129_v41  ;;  %v2181_v56 = vrot.slane %v2129_v41, 2  ;;  %v2178_v48 = vsel %vm795_vm10, %v2175_v49, %v2177_v20 }
 0x357   : > { %2637 = shalt.err (!%p2634_p4)
}
 0x358   : > { %s2638_s12 = scalar_lea.hbm %s4271_s11, 1536  ;;  %s2642_s9 = scalar_lea.hbm %s4422_s2, 3072 }
 0x359   : > { %p2639_p5 = scmp.ne.s32.totalorder %s4271_s11, %s2638_s12  ;;  %p2643_p1 = scmp.lt.u32.totalorder %s4271_s11, %s4422_s2 }
 0x35a   : > { %p2644_p3 = scmp.lt.u32.totalorder %s2642_s9, %s2638_s12  ;;  %p2646_p11 = scmp.lt.u32.totalorder %s2638_s12, %s4271_s11 }
 0x35b   : > { %p2640_p7 = pnand %p2639_p5, %p4549_p12 }
 0x35c   : > { %p2645_p6 = por %p2644_p3, %p2643_p1 }
 0x35d   : > { %p2641_p9 = pneg %p2640_p7 }
 0x35e   : > { %p2647_p13 = por %p2646_p11, %p2645_p6 }
 0x360   : > { %p2648_p8 = pnand %p2647_p13, %p2641_p9 }
 0x362   : > { %2651 = shalt.err (!%p2648_p8)
}
 0x363   : > { %s2763_s6 = smov 128   ;;  %s2764_s20 = smov 8   ;;  %2089 = vst [vmem:[%s4237_s22 + $0x2] sm:$0x1] %v2086_v27  ;;  %v2180_v52 = vsel %vm795_vm10, %v2177_v20, %v2179_v12  ;;  %v2182_v30 = vsel %vm795_vm10, %v2179_v12, %v2181_v56  ;;  %v4550_v32 = vld [vmem:[#allocation13_spill] sm:$0xff]  ;;  %v4552_v61 = vld [vmem:[#allocation22_spill] sm:$0xff] }
 0x364   : > { %2476 = dma.vmem_to_hbm [thread:$0]  (%p4549_p12), %s4275_s25, 1536, %s4271_s11, %s2229_s5, %s2763_s6, %s2763_s6, %s2764_s20   ;;  %v2208_v60 = vmul.f32 %v4550_v32, %v2176_v55  ;;  %v4551_v34 = vld [vmem:[#allocation21_spill] sm:$0xff]  ;;  %v2210_v13 = vmul.f32 %v4552_v61, %v2180_v52  ;;  %v4553_v11 = vld [vmem:[#allocation15_spill] sm:$0xff] }
 0x365   : > { %v2209_v15 = vmul.f32 %v4551_v34, %v2178_v48  ;;  %s4326_s10 = scalar_lea.hbm %s4423_s3, %s2467_s23  ;;  %v2211_v33 = vmul.f32 %v4553_v11, %v2182_v30  ;;  %s4339_s11 = scalar_lea.hbm %s4424_s4, %s2473_s28 }
 0x366   : > { %s4554_s5 = sshll.u32 %s4237_s22, 4  ;;  %2220 = vst [vmem:[%s4224_s14 + $0x20] sm:$0xff] %v2208_v60  ;;  %2222 = vst [vmem:[%s4224_s14 + $0x30] sm:$0xff] %v2210_v13  ;;  %s4555_s23 = sand.u32 1, %s2815_s19   ;;  %s4343_s5 = int_to_ptr.vmem [resolvable:$true] %s4554_s5 }
 0x367   : > { %2221 = vst [vmem:[%s4224_s14 + $0x28] sm:$0xff] %v2209_v15  ;;  %2223 = vst [vmem:[%s4224_s14 + $0x38] sm:$0xff] %v2211_v33  ;;  %s4351_s12 = scalar_lea.sflag [#allocation8], %s4555_s23  ;;  %s2652_s9 = scalar_lea.vmem %s4330_s29, 1536 }
 0x368   : > { %p2653_p10 = scmp.ne.s32.totalorder %s4330_s29, %s2652_s9  ;;  %s2765_s8 = smov [#allocation7]  }
 0x369   : > { %s2656_s7 = sshll.u32 %s2765_s8, 4  ;;  %s2657_s7 = int_to_ptr.vmem [resolvable:$false] %s2656_s7 }
 0x36a   : > { %p2654_p0 = pnand %p2653_p10, %p4549_p12  ;;  %s2658_s28 = scalar_lea.vmem %s2657_s7, 3072 }
 0x36b   : > { %p2659_p4 = scmp.lt.s32.totalorder %s4330_s29, %s2657_s7  ;;  %p2660_p5 = scmp.lt.s32.totalorder %s2658_s28, %s2652_s9 }
 0x36c   : > { %p2655_p2 = pneg %p2654_p0 }
 0x36d   : > { %p2661_p7 = por %p2660_p5, %p2659_p4 }
 0x36f   : > { %p2662_p9 = pnand %p2661_p7, %p2655_p2 }
 0x371   : > { %2665 = shalt.err (!%p2662_p9)
}
 0x372   : > { %s2666_s19 = scalar_lea.hbm %s4326_s10, 1536  ;;  %s2670_s30 = scalar_lea.hbm %s4423_s3, 3072 }
 0x373   : > { %p2667_p1 = scmp.ne.s32.totalorder %s4326_s10, %s2666_s19  ;;  %p2671_p11 = scmp.lt.u32.totalorder %s4326_s10, %s4423_s3 }
 0x374   : > { %p2672_p13 = scmp.lt.u32.totalorder %s2670_s30, %s2666_s19  ;;  %p2674_p10 = scmp.lt.u32.totalorder %s2666_s19, %s4326_s10 }
 0x375   : > { %p2668_p3 = pnand %p2667_p1, %p4549_p12 }
 0x376   : > { %p2673_p8 = por %p2672_p13, %p2671_p11 }
 0x377   : > { %p2669_p6 = pneg %p2668_p3 }
 0x378   : > { %p2675_p0 = por %p2674_p10, %p2673_p8 }
 0x37a   : > { %p2676_p2 = pnand %p2675_p0, %p2669_p6 }
 0x37c   : > { %2679 = shalt.err (!%p2676_p2)
}
 0x37d   : > { %2477 = dma.vmem_to_hbm [thread:$0]  (%p4549_p12), %s4330_s29, 1536, %s4326_s10, %s4351_s12, %s2763_s6, %s2763_s6, %s2764_s20  }
 0x37e   : > { %s2680_s23 = scalar_lea.vmem %s4343_s5, 48  ;;  %s2766_s9 = smov [#allocation9]  }
 0x37f   : > { %p2681_p4 = scmp.ne.s32.totalorder %s4343_s5, %s2680_s23  ;;  %s2684_s8 = sshll.u32 %s2766_s9, 4  ;;  %s2685_s8 = int_to_ptr.vmem [resolvable:$false] %s2684_s8 }
 0x380   : > { %s2686_s7 = scalar_lea.vmem %s2685_s8, 96  ;;  %p2687_p9 = scmp.lt.s32.totalorder %s4343_s5, %s2685_s8 }
 0x381   : > { %p2682_p5 = pnand %p2681_p4, %p4549_p12  ;;  %p2688_p1 = scmp.lt.s32.totalorder %s2686_s7, %s2680_s23 }
 0x383   : > { %p2683_p7 = pneg %p2682_p5  ;;  %p2689_p3 = por %p2688_p1, %p2687_p9 }
 0x385   : > { %p2690_p6 = pnand %p2689_p3, %p2683_p7 }
 0x387   : > { %2693 = shalt.err (!%p2690_p6)
}
 0x388   : > { %s2694_s29 = scalar_lea.hbm %s4339_s11, 48  ;;  %s2698_s10 = scalar_lea.hbm %s4424_s4, 96 }
 0x389   : > { %p2695_p11 = scmp.ne.s32.totalorder %s4339_s11, %s2694_s29  ;;  %p2699_p10 = scmp.lt.u32.totalorder %s4339_s11, %s4424_s4 }
 0x38a   : > { %p2700_p0 = scmp.lt.u32.totalorder %s2698_s10, %s2694_s29  ;;  %p2702_p4 = scmp.lt.u32.totalorder %s2694_s29, %s4339_s11 }
 0x38b   : > { %p2696_p13 = pnand %p2695_p11, %p4549_p12 }
 0x38c   : > { %p2701_p2 = por %p2700_p0, %p2699_p10 }
 0x38d   : > { %p2697_p8 = pneg %p2696_p13 }
 0x38e   : > { %p2703_p5 = por %p2702_p4, %p2701_p2 }
 0x390   : > { %p2704_p7 = pnand %p2703_p5, %p2697_p8 }
 0x392   : > { %2707 = shalt.err (!%p2704_p7)
}
 0x393   : > { %s2767_s14 = smov 16   ;;  %s2768_s22 = smov 1  }
 0x394   : > { %2478 = dma.vmem_to_hbm [thread:$0]  (%p4549_p12), %s4343_s5, 48, %s4339_s11, %s4351_s12, %s2767_s14, %s2767_s14, %s2768_s22  }
 0x395 PF: > { %s2301_s30 = sand.u32 1, %s2738_s15   ;;  %p4556_p9 = scmp.ne.s32.totalorder %s4463_s27, 0 }
 0x396   : > { %p4557_p1 = scmp.ge.s32.totalorder %s2750_s18, 2  ;;  %s2302_s13 = scalar_lea.sflag [#allocation5], %s2301_s30 }
 0x398   : > { %p2487_p3 = pnand %p4557_p1, %p4556_p9 }
 0x39a   : > { %2729 = dma.done.wait (!%p2487_p3), %s2302_s13, 1536  }
 0x39b   : > { %2731 = vsyncadd (!%p2487_p3), %s2302_s13, 4294965760  ;;  %s4558_s25 = sadd.s32 4294967294, %s2750_s18  }
 0x39c   : > { %s2310_s23 = sand.u32 1, %s4558_s25  }
 0x39d   : > { %s2311_s9 = scalar_lea.sflag [#allocation8], %s2310_s23 }
 0x39e   : > { %2733 = dma.done.wait (!%p2487_p3), %s2311_s9, 1584  }
 0x39f   : > { %2735 = vsyncadd (!%p2487_p3), %s2311_s9, 4294965712  ;;  %p21_p12 = scmp.ge.s32.totalorder %s2819_s21, 4   ;;  %s4559_s15 = smov %s2742_s16 }
 0x3a0   : > { %s4560_s16 = smov %s2746_s17  ;;  %s4561_s17 = smov %s2831_s24 }
 0x3a1   : > { %s4562_s18 = smov %s2819_s21  ;;  %23 = sbr.rel (!%p21_p12) target bundleno = 7 (0x7), region = 108 }
 0x3a8   :  { %2325 = vsyncpa [#allocation4], 1 }
 0x3a9   :  { %2327 = vsyncpa [#allocation4 + $0x1], 1 }
 0x3aa   :  { %2328 = vsyncpa [#allocation5], 1 }
 0x3ab   :  { %2330 = vsyncpa [#allocation5 + $0x1], 1 }
 0x3ac   :  { %2331 = vsyncpa [#allocation8], 1 }
 0x3ad   :  { %2333 = vsyncpa [#allocation8 + $0x1], 1 }

</bundles_post_ra>
